<compile_context>
chip_gen: v5e
topology: v5e:2x2
jax: 0.10.0
libtpu: 0.0.40
codegen_flags: <defaults>
</compile_context>

<pallas_src>
import jax
import jax.numpy as jnp
from jax.experimental import pallas as pl
from jax.experimental.pallas import tpu as pltpu

# Small, self-consistent shapes.
B = 2            # batch
S = 8            # sequence length == memory_size
H = 32           # hidden size
NH = 4           # attention heads
HD = H // NH     # head dim
FF = 64          # feed-forward inner dim
VOCAB = 50       # vocab size
NUM_LAYERS = 2
EPS = 1e-9       # Funnel layer_norm_eps (nn.LayerNorm default would be 1e-5)

BS = B * S       # flattened row count
NVEC = 8         # packed per-layer vector rows: bqkv, bo, g1, b1, bb1, bb2, g2, b2
VW = 3 * H       # packed-vector row width (>= 3H, FF, H)

# The in-kernel block-diagonal mask uses a bitwise block-id trick (S power of 2).
assert S & (S - 1) == 0, "S must be a power of two (else use // S for block ids)"
assert VW >= FF and VW >= H


def _layer_norm(x, g, b):
    mean = jnp.mean(x, axis=-1, keepdims=True)
    var = jnp.mean((x - mean) ** 2, axis=-1, keepdims=True)
    return (x - mean) * jax.lax.rsqrt(var + EPS) * g + b


# ---------------------------------------------------------------------------
# Single fused kernel: embeddings-LN + memory add + NUM_LAYERS encoder layers
# ---------------------------------------------------------------------------
def fused_forward_kernel(emb_ref, mem_ref, embln_ref,
                         wqkv_ref, wo_ref, w1_ref, w2_ref, vec_ref,
                         o_ref):
    # ---- embeddings(): LayerNorm, then + memory ---------------------------
    ln = embln_ref[...]                                       # (2, H): [gamma; beta]
    x = _layer_norm(emb_ref[...], ln[0:1, :], ln[1:2, :]) + mem_ref[...]   # (BS, H)

    # Block-diagonal additive mask so each batch element only attends to
    # itself (lets attention run on the flat (B*S, H) slab with full-M matmuls).
    ri = jax.lax.broadcasted_iota(jnp.int32, (BS, BS), 0)
    ci = jax.lax.broadcasted_iota(jnp.int32, (BS, BS), 1)
    blk = jnp.int32(~(S - 1))                                 # clear low bits -> batch id
    bias = jnp.where((ri & blk) == (ci & blk), 0.0, -1e30).astype(jnp.float32)

    scale = 1.0 / (HD ** 0.5)

    for l in range(NUM_LAYERS):                               # static unroll over layers
        wqkv = wqkv_ref[l]                                    # (H, 3H)
        wo = wo_ref[l]                                        # (H, H)
        w1 = w1_ref[l]                                        # (H, FF)
        w2 = w2_ref[l]                                        # (FF, H)
        vec = vec_ref[l]                                      # (NVEC, 3H) packed vectors
        bqkv = vec[0:1, :3 * H]
        bo = vec[1:2, :H]
        g1, b1 = vec[2:3, :H], vec[3:4, :H]
        bb1 = vec[4:5, :FF]
        bb2 = vec[5:6, :H]
        g2, b2 = vec[6:7, :H], vec[7:8, :H]

        # Fused Q/K/V projection: one MXU push + one bias add.
        qkv = jnp.dot(x, wqkv, preferred_element_type=jnp.float32) + bqkv   # (BS, 3H)
        q = qkv[:, 0 * H:1 * H]
        k = qkv[:, 1 * H:2 * H]
        v = qkv[:, 2 * H:3 * H]

        # Per-head attention over the flat slab; the additive mask enforces the
        # per-example block structure.  NH is tiny & static; a head-batched
        # dot_general would need lane-splitting reshapes/transposes that cost
        # more than these 16-row matmuls at this size.
        ctx_heads = []
        for h in range(NH):
            qh = q[:, h * HD:(h + 1) * HD]                    # (BS, HD)
            kh = k[:, h * HD:(h + 1) * HD]
            vh = v[:, h * HD:(h + 1) * HD]
            s = jnp.dot(qh, kh.T, preferred_element_type=jnp.float32) * scale + bias
            s = s - jnp.max(s, axis=-1, keepdims=True)        # stable softmax
            p = jnp.exp(s)
            p = p * pl.reciprocal(jnp.sum(p, axis=-1, keepdims=True), approx=True)
            ctx_heads.append(jnp.dot(p, vh, preferred_element_type=jnp.float32))
        ctx = jnp.concatenate(ctx_heads, axis=-1)             # (BS, H)

        attn = jnp.dot(ctx, wo, preferred_element_type=jnp.float32) + bo
        h1 = _layer_norm(x + attn, g1, b1)

        ff = jnp.dot(h1, w1, preferred_element_type=jnp.float32) + bb1
        # tanh-approx GELU
        ff = 0.5 * ff * (1.0 + jnp.tanh(0.7978845608028654 * (ff + 0.044715 * ff ** 3)))
        ff = jnp.dot(ff, w2, preferred_element_type=jnp.float32) + bb2
        x = _layer_norm(h1 + ff, g2, b2)

    o_ref[...] = x                                            # (BS, H)


# ---------------------------------------------------------------------------
# pallas_call wrapper: single grid step, everything resident in VMEM
# (total weights + activations << 1 MiB, well under VMEM on v5e/v6e/v7x).
# ---------------------------------------------------------------------------
def fused_forward(emb_flat, mem_flat, emb_ln, wqkv, wo, w1, w2, vecs):
    args = (emb_flat, mem_flat, emb_ln, wqkv, wo, w1, w2, vecs)

    def full_spec(a):
        return pl.BlockSpec(a.shape, lambda i, _n=a.ndim: (0,) * _n)

    return pl.pallas_call(
        fused_forward_kernel,
        out_shape=jax.ShapeDtypeStruct((BS, H), jnp.float32),
        grid=(1,),                                            # one step — no serial grid overhead
        in_specs=[full_spec(a) for a in args],
        out_specs=pl.BlockSpec((BS, H), lambda i: (0, 0)),
        compiler_params=pltpu.CompilerParams(dimension_semantics=("arbitrary",)),
    )(*args)


# ---------------------------------------------------------------------------
# Parameter init (deterministic, synthetic) — packed for the fused kernel
# ---------------------------------------------------------------------------
def _pack_vecs(*rows):
    out = []
    for r in rows:
        r = jnp.asarray(r, jnp.float32).reshape(1, -1)
        out.append(jnp.pad(r, ((0, 0), (0, VW - r.shape[1]))))
    return jnp.concatenate(out, axis=0)                       # (NVEC, VW)


def init_params(key):
    keys = iter(jax.random.split(key, 32))

    def nrm(shape, scale=0.02):
        return (scale * jax.random.normal(next(keys), shape)).astype(jnp.float32)

    params = {
        "embed": nrm((VOCAB, H), 1.0),
        "emb_ln": jnp.concatenate([jnp.ones((1, H), jnp.float32),
                                   jnp.zeros((1, H), jnp.float32)], axis=0),  # [gamma; beta]
        # nn.Parameter(torch.randn(memory_size, hidden)) with memory_size == S
        "memory": jax.random.normal(next(keys), (S, H)).astype(jnp.float32),
    }

    wqkv, wo, w1, w2, vecs = [], [], [], [], []
    zH = jnp.zeros((H,), jnp.float32)
    oH = jnp.ones((H,), jnp.float32)
    zF = jnp.zeros((FF,), jnp.float32)
    for _ in range(NUM_LAYERS):
        wq, wk, wv = nrm((H, H)), nrm((H, H)), nrm((H, H))
        wqkv.append(jnp.concatenate([wq, wk, wv], axis=1))    # (H, 3H) fused QKV
        wo.append(nrm((H, H)))
        w1.append(nrm((H, FF)))
        w2.append(nrm((FF, H)))
        vecs.append(_pack_vecs(jnp.zeros((3 * H,), jnp.float32),  # bqkv
                               zH,                                # bo
                               oH, zH,                            # LN1 gamma, beta
                               zF,                                # bb1
                               zH,                                # bb2
                               oH, zH))                           # LN2 gamma, beta
    params["wqkv"] = jnp.stack(wqkv)                          # (L, H, 3H)
    params["wo"] = jnp.stack(wo)                              # (L, H, H)
    params["w1"] = jnp.stack(w1)                              # (L, H, FF)
    params["w2"] = jnp.stack(w2)                              # (L, FF, H)
    params["vecs"] = jnp.stack(vecs)                          # (L, NVEC, 3H)
    return params


# ---------------------------------------------------------------------------
# Forward pass (mirrors the PyTorch module)
# ---------------------------------------------------------------------------
@jax.jit
def forward(params, token_ids):
    # Embedding gather + layout plumbing are glue (plain JAX); all dense
    # compute happens in the single fused Pallas kernel.
    emb = params["embed"][token_ids].reshape(BS, H)           # (B*S, H)
    mem = jnp.tile(params["memory"], (B, 1))                  # (B*S, H), memory_size == S
    out = fused_forward(emb, mem, params["emb_ln"],
                        params["wqkv"], params["wo"],
                        params["w1"], params["w2"], params["vecs"])
    return out.reshape(B, S, H)                               # == base_model(x)[0]


if __name__ == "__main__":
    key = jax.random.PRNGKey(0)
    pkey, dkey = jax.random.split(key)
    params = init_params(pkey)
    assert params["memory"].shape == (S, H)                   # seq_len == memory_size
    token_ids = jax.random.randint(dkey, (B, S), 0, VOCAB, dtype=jnp.int32)

    out = forward(params, token_ids)
    jax.block_until_ready(out)
    assert out.shape == (B, S, H), out.shape
    assert out.dtype == jnp.float32
    assert bool(jnp.all(jnp.isfinite(out)))
    print("KERNEL_OK")
</pallas_src>

<mosaic_0001>
module attributes {stable_mosaic.version = 11 : i64} {
  func.func @fused_forward_kernel(%arg0: i32, %arg1: memref<16x32xf32, #tpu.memory_space<vmem>>, %arg2: memref<16x32xf32, #tpu.memory_space<vmem>>, %arg3: memref<2x32xf32, #tpu.memory_space<vmem>>, %arg4: memref<2x32x96xf32, #tpu.memory_space<vmem>>, %arg5: memref<2x32x32xf32, #tpu.memory_space<vmem>>, %arg6: memref<2x32x64xf32, #tpu.memory_space<vmem>>, %arg7: memref<2x64x32xf32, #tpu.memory_space<vmem>>, %arg8: memref<2x8x96xf32, #tpu.memory_space<vmem>>, %arg9: memref<16x32xf32, #tpu.memory_space<vmem>>) attributes {dimension_semantics = [#tpu.dimension_semantics<arbitrary>], iteration_bounds = array<i64: 1>, scalar_prefetch = 0 : i64, scratch_operands = 0 : i64, tpu.core_type = #tpu.core_type<tc>, window_params = [{pipeline_mode = #tpu.pipeline_mode<synchronous>, transform_indices = @transform_0, window_bounds = array<i64: 16, 32>}, {pipeline_mode = #tpu.pipeline_mode<synchronous>, transform_indices = @transform_1, window_bounds = array<i64: 16, 32>}, {pipeline_mode = #tpu.pipeline_mode<synchronous>, transform_indices = @transform_2, window_bounds = array<i64: 2, 32>}, {pipeline_mode = #tpu.pipeline_mode<synchronous>, transform_indices = @transform_3, window_bounds = array<i64: 2, 32, 96>}, {pipeline_mode = #tpu.pipeline_mode<synchronous>, transform_indices = @transform_4, window_bounds = array<i64: 2, 32, 32>}, {pipeline_mode = #tpu.pipeline_mode<synchronous>, transform_indices = @transform_5, window_bounds = array<i64: 2, 32, 64>}, {pipeline_mode = #tpu.pipeline_mode<synchronous>, transform_indices = @transform_6, window_bounds = array<i64: 2, 64, 32>}, {pipeline_mode = #tpu.pipeline_mode<synchronous>, transform_indices = @transform_7, window_bounds = array<i64: 2, 8, 96>}, {pipeline_mode = #tpu.pipeline_mode<synchronous>, transform_indices = @transform_8, window_bounds = array<i64: 16, 32>}]} {
    %c0 = arith.constant 0 : index
    %c0_0 = arith.constant 0 : index
    %0 = vector.load %arg3[%c0, %c0_0] : memref<2x32xf32, #tpu.memory_space<vmem>>, vector<2x32xf32>
    %c0_1 = arith.constant 0 : index
    %c0_2 = arith.constant 0 : index
    %1 = vector.load %arg1[%c0_1, %c0_2] : memref<16x32xf32, #tpu.memory_space<vmem>>, vector<16x32xf32>
    %2 = vector.extract_strided_slice %0 {offsets = [0, 0], sizes = [1, 32], strides = [1, 1]} : vector<2x32xf32> to vector<1x32xf32>
    %3 = vector.extract_strided_slice %0 {offsets = [1, 0], sizes = [1, 32], strides = [1, 1]} : vector<2x32xf32> to vector<1x32xf32>
    %cst = arith.constant dense<0.000000e+00> : vector<16xf32>
    %4 = vector.multi_reduction <add>, %1, %cst [1] : vector<16x32xf32> to vector<16xf32>
    %5 = vector.shape_cast %4 : vector<16xf32> to vector<16x1xf32>
    %cst_3 = arith.constant 3.200000e+01 : f32
    %6 = vector.broadcast %cst_3 : f32 to vector<16x1xf32>
    %7 = arith.divf %5, %6 : vector<16x1xf32>
    %8 = vector.broadcast %7 : vector<16x1xf32> to vector<16x32xf32>
    %9 = arith.subf %1, %8 : vector<16x32xf32>
    %10 = arith.mulf %9, %9 : vector<16x32xf32>
    %cst_4 = arith.constant dense<0.000000e+00> : vector<16xf32>
    %11 = vector.multi_reduction <add>, %10, %cst_4 [1] : vector<16x32xf32> to vector<16xf32>
    %12 = vector.shape_cast %11 : vector<16xf32> to vector<16x1xf32>
    %cst_5 = arith.constant 3.200000e+01 : f32
    %13 = vector.broadcast %cst_5 : f32 to vector<16x1xf32>
    %14 = arith.divf %12, %13 : vector<16x1xf32>
    %15 = vector.broadcast %7 : vector<16x1xf32> to vector<16x32xf32>
    %16 = arith.subf %1, %15 : vector<16x32xf32>
    %cst_6 = arith.constant 9.99999971E-10 : f32
    %17 = vector.broadcast %cst_6 : f32 to vector<16x1xf32>
    %18 = arith.addf %14, %17 : vector<16x1xf32>
    %19 = math.rsqrt %18 : vector<16x1xf32>
    %20 = vector.broadcast %19 : vector<16x1xf32> to vector<16x32xf32>
    %21 = arith.mulf %16, %20 : vector<16x32xf32>
    %22 = vector.broadcast %2 : vector<1x32xf32> to vector<16x32xf32>
    %23 = arith.mulf %21, %22 : vector<16x32xf32>
    %24 = vector.broadcast %3 : vector<1x32xf32> to vector<16x32xf32>
    %25 = arith.addf %23, %24 : vector<16x32xf32>
    %c0_7 = arith.constant 0 : index
    %c0_8 = arith.constant 0 : index
    %26 = vector.load %arg2[%c0_7, %c0_8] : memref<16x32xf32, #tpu.memory_space<vmem>>, vector<16x32xf32>
    %27 = arith.addf %25, %26 : vector<16x32xf32>
    %28 = tpu.iota {dimensions = array<i32: 0>} : vector<16x16xi32>
    %29 = tpu.iota {dimensions = array<i32: 1>} : vector<16x16xi32>
    %c-8_i32 = arith.constant -8 : i32
    %30 = vector.broadcast %c-8_i32 : i32 to vector<16x16xi32>
    %31 = arith.andi %28, %30 : vector<16x16xi32>
    %c-8_i32_9 = arith.constant -8 : i32
    %32 = vector.broadcast %c-8_i32_9 : i32 to vector<16x16xi32>
    %33 = arith.andi %29, %32 : vector<16x16xi32>
    %34 = arith.cmpi eq, %31, %33 : vector<16x16xi32>
    %cst_10 = arith.constant 0.000000e+00 : f32
    %cst_11 = arith.constant -1.000000e+30 : f32
    %35 = vector.broadcast %cst_10 : f32 to vector<16x16xf32>
    %36 = vector.broadcast %cst_11 : f32 to vector<16x16xf32>
    %37 = arith.select %34, %35, %36 : vector<16x16xi1>, vector<16x16xf32>
    %c0_12 = arith.constant 0 : index
    %c0_13 = arith.constant 0 : index
    %c0_14 = arith.constant 0 : index
    %38 = vector.load %arg4[%c0_12, %c0_13, %c0_14] : memref<2x32x96xf32, #tpu.memory_space<vmem>>, vector<1x32x96xf32>
    %39 = vector.shape_cast %38 : vector<1x32x96xf32> to vector<32x96xf32>
    %c0_15 = arith.constant 0 : index
    %c0_16 = arith.constant 0 : index
    %c0_17 = arith.constant 0 : index
    %40 = vector.load %arg5[%c0_15, %c0_16, %c0_17] : memref<2x32x32xf32, #tpu.memory_space<vmem>>, vector<1x32x32xf32>
    %41 = vector.shape_cast %40 : vector<1x32x32xf32> to vector<32x32xf32>
    %c0_18 = arith.constant 0 : index
    %c0_19 = arith.constant 0 : index
    %c0_20 = arith.constant 0 : index
    %42 = vector.load %arg6[%c0_18, %c0_19, %c0_20] : memref<2x32x64xf32, #tpu.memory_space<vmem>>, vector<1x32x64xf32>
    %43 = vector.shape_cast %42 : vector<1x32x64xf32> to vector<32x64xf32>
    %c0_21 = arith.constant 0 : index
    %c0_22 = arith.constant 0 : index
    %c0_23 = arith.constant 0 : index
    %44 = vector.load %arg7[%c0_21, %c0_22, %c0_23] : memref<2x64x32xf32, #tpu.memory_space<vmem>>, vector<1x64x32xf32>
    %45 = vector.shape_cast %44 : vector<1x64x32xf32> to vector<64x32xf32>
    %c0_24 = arith.constant 0 : index
    %c0_25 = arith.constant 0 : index
    %c0_26 = arith.constant 0 : index
    %46 = vector.load %arg8[%c0_24, %c0_25, %c0_26] : memref<2x8x96xf32, #tpu.memory_space<vmem>>, vector<1x8x96xf32>
    %47 = vector.shape_cast %46 : vector<1x8x96xf32> to vector<8x96xf32>
    %48 = vector.extract_strided_slice %47 {offsets = [0, 0], sizes = [1, 96], strides = [1, 1]} : vector<8x96xf32> to vector<1x96xf32>
    %49 = vector.extract_strided_slice %47 {offsets = [1, 0], sizes = [1, 32], strides = [1, 1]} : vector<8x96xf32> to vector<1x32xf32>
    %50 = vector.extract_strided_slice %47 {offsets = [2, 0], sizes = [1, 32], strides = [1, 1]} : vector<8x96xf32> to vector<1x32xf32>
    %51 = vector.extract_strided_slice %47 {offsets = [3, 0], sizes = [1, 32], strides = [1, 1]} : vector<8x96xf32> to vector<1x32xf32>
    %52 = vector.extract_strided_slice %47 {offsets = [4, 0], sizes = [1, 64], strides = [1, 1]} : vector<8x96xf32> to vector<1x64xf32>
    %53 = vector.extract_strided_slice %47 {offsets = [5, 0], sizes = [1, 32], strides = [1, 1]} : vector<8x96xf32> to vector<1x32xf32>
    %54 = vector.extract_strided_slice %47 {offsets = [6, 0], sizes = [1, 32], strides = [1, 1]} : vector<8x96xf32> to vector<1x32xf32>
    %55 = vector.extract_strided_slice %47 {offsets = [7, 0], sizes = [1, 32], strides = [1, 1]} : vector<8x96xf32> to vector<1x32xf32>
    %cst_27 = arith.constant dense<0.000000e+00> : vector<16x96xf32>
    %56 = tpu.matmul %27, %39, %cst_27 {dimension_numbers = #tpu.dot_dimension_numbers<[1], [0], [0], [1], [0, 0, 1, 1], [], []>} : vector<16x32xf32>, vector<32x96xf32>, vector<16x96xf32> -> vector<16x96xf32>
    %57 = vector.broadcast %48 : vector<1x96xf32> to vector<16x96xf32>
    %58 = arith.addf %56, %57 : vector<16x96xf32>
    %59 = vector.extract_strided_slice %58 {offsets = [0, 0], sizes = [16, 32], strides = [1, 1]} : vector<16x96xf32> to vector<16x32xf32>
    %60 = vector.extract_strided_slice %58 {offsets = [0, 32], sizes = [16, 32], strides = [1, 1]} : vector<16x96xf32> to vector<16x32xf32>
    %61 = vector.extract_strided_slice %58 {offsets = [0, 64], sizes = [16, 32], strides = [1, 1]} : vector<16x96xf32> to vector<16x32xf32>
    %62 = vector.extract_strided_slice %59 {offsets = [0, 0], sizes = [16, 8], strides = [1, 1]} : vector<16x32xf32> to vector<16x8xf32>
    %63 = vector.extract_strided_slice %60 {offsets = [0, 0], sizes = [16, 8], strides = [1, 1]} : vector<16x32xf32> to vector<16x8xf32>
    %64 = vector.extract_strided_slice %61 {offsets = [0, 0], sizes = [16, 8], strides = [1, 1]} : vector<16x32xf32> to vector<16x8xf32>
    %65 = tpu.transpose %63, [1, 0] : vector<16x8xf32> -> vector<8x16xf32>
    %cst_28 = arith.constant dense<0.000000e+00> : vector<16x16xf32>
    %66 = tpu.matmul %62, %65, %cst_28 {dimension_numbers = #tpu.dot_dimension_numbers<[1], [0], [0], [1], [0, 0, 1, 1], [], []>} : vector<16x8xf32>, vector<8x16xf32>, vector<16x16xf32> -> vector<16x16xf32>
    %cst_29 = arith.constant 0.353553385 : f32
    %67 = vector.broadcast %cst_29 : f32 to vector<16x16xf32>
    %68 = arith.mulf %66, %67 : vector<16x16xf32>
    %69 = arith.addf %68, %37 : vector<16x16xf32>
    %cst_30 = arith.constant dense<0xFF800000> : vector<16xf32>
    %70 = vector.multi_reduction <maximumf>, %69, %cst_30 [1] : vector<16x16xf32> to vector<16xf32>
    %71 = vector.shape_cast %70 : vector<16xf32> to vector<16x1xf32>
    %72 = vector.broadcast %71 : vector<16x1xf32> to vector<16x16xf32>
    %73 = arith.subf %69, %72 : vector<16x16xf32>
    %74 = math.exp %73 : vector<16x16xf32>
    %cst_31 = arith.constant dense<0.000000e+00> : vector<16xf32>
    %75 = vector.multi_reduction <add>, %74, %cst_31 [1] : vector<16x16xf32> to vector<16xf32>
    %76 = vector.shape_cast %75 : vector<16xf32> to vector<16x1xf32>
    %77 = tpu.reciprocal %76 {approx = true} : vector<16x1xf32> -> vector<16x1xf32>
    %78 = vector.broadcast %77 : vector<16x1xf32> to vector<16x16xf32>
    %79 = arith.mulf %74, %78 : vector<16x16xf32>
    %cst_32 = arith.constant dense<0.000000e+00> : vector<16x8xf32>
    %80 = tpu.matmul %79, %64, %cst_32 {dimension_numbers = #tpu.dot_dimension_numbers<[1], [0], [0], [1], [0, 0, 1, 1], [], []>} : vector<16x16xf32>, vector<16x8xf32>, vector<16x8xf32> -> vector<16x8xf32>
    %81 = vector.extract_strided_slice %59 {offsets = [0, 8], sizes = [16, 8], strides = [1, 1]} : vector<16x32xf32> to vector<16x8xf32>
    %82 = vector.extract_strided_slice %60 {offsets = [0, 8], sizes = [16, 8], strides = [1, 1]} : vector<16x32xf32> to vector<16x8xf32>
    %83 = vector.extract_strided_slice %61 {offsets = [0, 8], sizes = [16, 8], strides = [1, 1]} : vector<16x32xf32> to vector<16x8xf32>
    %84 = tpu.transpose %82, [1, 0] : vector<16x8xf32> -> vector<8x16xf32>
    %cst_33 = arith.constant dense<0.000000e+00> : vector<16x16xf32>
    %85 = tpu.matmul %81, %84, %cst_33 {dimension_numbers = #tpu.dot_dimension_numbers<[1], [0], [0], [1], [0, 0, 1, 1], [], []>} : vector<16x8xf32>, vector<8x16xf32>, vector<16x16xf32> -> vector<16x16xf32>
    %cst_34 = arith.constant 0.353553385 : f32
    %86 = vector.broadcast %cst_34 : f32 to vector<16x16xf32>
    %87 = arith.mulf %85, %86 : vector<16x16xf32>
    %88 = arith.addf %87, %37 : vector<16x16xf32>
    %cst_35 = arith.constant dense<0xFF800000> : vector<16xf32>
    %89 = vector.multi_reduction <maximumf>, %88, %cst_35 [1] : vector<16x16xf32> to vector<16xf32>
    %90 = vector.shape_cast %89 : vector<16xf32> to vector<16x1xf32>
    %91 = vector.broadcast %90 : vector<16x1xf32> to vector<16x16xf32>
    %92 = arith.subf %88, %91 : vector<16x16xf32>
    %93 = math.exp %92 : vector<16x16xf32>
    %cst_36 = arith.constant dense<0.000000e+00> : vector<16xf32>
    %94 = vector.multi_reduction <add>, %93, %cst_36 [1] : vector<16x16xf32> to vector<16xf32>
    %95 = vector.shape_cast %94 : vector<16xf32> to vector<16x1xf32>
    %96 = tpu.reciprocal %95 {approx = true} : vector<16x1xf32> -> vector<16x1xf32>
    %97 = vector.broadcast %96 : vector<16x1xf32> to vector<16x16xf32>
    %98 = arith.mulf %93, %97 : vector<16x16xf32>
    %cst_37 = arith.constant dense<0.000000e+00> : vector<16x8xf32>
    %99 = tpu.matmul %98, %83, %cst_37 {dimension_numbers = #tpu.dot_dimension_numbers<[1], [0], [0], [1], [0, 0, 1, 1], [], []>} : vector<16x16xf32>, vector<16x8xf32>, vector<16x8xf32> -> vector<16x8xf32>
    %100 = vector.extract_strided_slice %59 {offsets = [0, 16], sizes = [16, 8], strides = [1, 1]} : vector<16x32xf32> to vector<16x8xf32>
    %101 = vector.extract_strided_slice %60 {offsets = [0, 16], sizes = [16, 8], strides = [1, 1]} : vector<16x32xf32> to vector<16x8xf32>
    %102 = vector.extract_strided_slice %61 {offsets = [0, 16], sizes = [16, 8], strides = [1, 1]} : vector<16x32xf32> to vector<16x8xf32>
    %103 = tpu.transpose %101, [1, 0] : vector<16x8xf32> -> vector<8x16xf32>
    %cst_38 = arith.constant dense<0.000000e+00> : vector<16x16xf32>
    %104 = tpu.matmul %100, %103, %cst_38 {dimension_numbers = #tpu.dot_dimension_numbers<[1], [0], [0], [1], [0, 0, 1, 1], [], []>} : vector<16x8xf32>, vector<8x16xf32>, vector<16x16xf32> -> vector<16x16xf32>
    %cst_39 = arith.constant 0.353553385 : f32
    %105 = vector.broadcast %cst_39 : f32 to vector<16x16xf32>
    %106 = arith.mulf %104, %105 : vector<16x16xf32>
    %107 = arith.addf %106, %37 : vector<16x16xf32>
    %cst_40 = arith.constant dense<0xFF800000> : vector<16xf32>
    %108 = vector.multi_reduction <maximumf>, %107, %cst_40 [1] : vector<16x16xf32> to vector<16xf32>
    %109 = vector.shape_cast %108 : vector<16xf32> to vector<16x1xf32>
    %110 = vector.broadcast %109 : vector<16x1xf32> to vector<16x16xf32>
    %111 = arith.subf %107, %110 : vector<16x16xf32>
    %112 = math.exp %111 : vector<16x16xf32>
    %cst_41 = arith.constant dense<0.000000e+00> : vector<16xf32>
    %113 = vector.multi_reduction <add>, %112, %cst_41 [1] : vector<16x16xf32> to vector<16xf32>
    %114 = vector.shape_cast %113 : vector<16xf32> to vector<16x1xf32>
    %115 = tpu.reciprocal %114 {approx = true} : vector<16x1xf32> -> vector<16x1xf32>
    %116 = vector.broadcast %115 : vector<16x1xf32> to vector<16x16xf32>
    %117 = arith.mulf %112, %116 : vector<16x16xf32>
    %cst_42 = arith.constant dense<0.000000e+00> : vector<16x8xf32>
    %118 = tpu.matmul %117, %102, %cst_42 {dimension_numbers = #tpu.dot_dimension_numbers<[1], [0], [0], [1], [0, 0, 1, 1], [], []>} : vector<16x16xf32>, vector<16x8xf32>, vector<16x8xf32> -> vector<16x8xf32>
    %119 = vector.extract_strided_slice %59 {offsets = [0, 24], sizes = [16, 8], strides = [1, 1]} : vector<16x32xf32> to vector<16x8xf32>
    %120 = vector.extract_strided_slice %60 {offsets = [0, 24], sizes = [16, 8], strides = [1, 1]} : vector<16x32xf32> to vector<16x8xf32>
    %121 = vector.extract_strided_slice %61 {offsets = [0, 24], sizes = [16, 8], strides = [1, 1]} : vector<16x32xf32> to vector<16x8xf32>
    %122 = tpu.transpose %120, [1, 0] : vector<16x8xf32> -> vector<8x16xf32>
    %cst_43 = arith.constant dense<0.000000e+00> : vector<16x16xf32>
    %123 = tpu.matmul %119, %122, %cst_43 {dimension_numbers = #tpu.dot_dimension_numbers<[1], [0], [0], [1], [0, 0, 1, 1], [], []>} : vector<16x8xf32>, vector<8x16xf32>, vector<16x16xf32> -> vector<16x16xf32>
    %cst_44 = arith.constant 0.353553385 : f32
    %124 = vector.broadcast %cst_44 : f32 to vector<16x16xf32>
    %125 = arith.mulf %123, %124 : vector<16x16xf32>
    %126 = arith.addf %125, %37 : vector<16x16xf32>
    %cst_45 = arith.constant dense<0xFF800000> : vector<16xf32>
    %127 = vector.multi_reduction <maximumf>, %126, %cst_45 [1] : vector<16x16xf32> to vector<16xf32>
    %128 = vector.shape_cast %127 : vector<16xf32> to vector<16x1xf32>
    %129 = vector.broadcast %128 : vector<16x1xf32> to vector<16x16xf32>
    %130 = arith.subf %126, %129 : vector<16x16xf32>
    %131 = math.exp %130 : vector<16x16xf32>
    %cst_46 = arith.constant dense<0.000000e+00> : vector<16xf32>
    %132 = vector.multi_reduction <add>, %131, %cst_46 [1] : vector<16x16xf32> to vector<16xf32>
    %133 = vector.shape_cast %132 : vector<16xf32> to vector<16x1xf32>
    %134 = tpu.reciprocal %133 {approx = true} : vector<16x1xf32> -> vector<16x1xf32>
    %135 = vector.broadcast %134 : vector<16x1xf32> to vector<16x16xf32>
    %136 = arith.mulf %131, %135 : vector<16x16xf32>
    %cst_47 = arith.constant dense<0.000000e+00> : vector<16x8xf32>
    %137 = tpu.matmul %136, %121, %cst_47 {dimension_numbers = #tpu.dot_dimension_numbers<[1], [0], [0], [1], [0, 0, 1, 1], [], []>} : vector<16x16xf32>, vector<16x8xf32>, vector<16x8xf32> -> vector<16x8xf32>
    %138 = tpu.concatenate %80, %99, %118, %137 in 1 : vector<16x8xf32>, vector<16x8xf32>, vector<16x8xf32>, vector<16x8xf32> -> vector<16x32xf32>
    %cst_48 = arith.constant dense<0.000000e+00> : vector<16x32xf32>
    %139 = tpu.matmul %138, %41, %cst_48 {dimension_numbers = #tpu.dot_dimension_numbers<[1], [0], [0], [1], [0, 0, 1, 1], [], []>} : vector<16x32xf32>, vector<32x32xf32>, vector<16x32xf32> -> vector<16x32xf32>
    %140 = vector.broadcast %49 : vector<1x32xf32> to vector<16x32xf32>
    %141 = arith.addf %139, %140 : vector<16x32xf32>
    %142 = arith.addf %27, %141 : vector<16x32xf32>
    %cst_49 = arith.constant dense<0.000000e+00> : vector<16xf32>
    %143 = vector.multi_reduction <add>, %142, %cst_49 [1] : vector<16x32xf32> to vector<16xf32>
    %144 = vector.shape_cast %143 : vector<16xf32> to vector<16x1xf32>
    %cst_50 = arith.constant 3.200000e+01 : f32
    %145 = vector.broadcast %cst_50 : f32 to vector<16x1xf32>
    %146 = arith.divf %144, %145 : vector<16x1xf32>
    %147 = vector.broadcast %146 : vector<16x1xf32> to vector<16x32xf32>
    %148 = arith.subf %142, %147 : vector<16x32xf32>
    %149 = arith.mulf %148, %148 : vector<16x32xf32>
    %cst_51 = arith.constant dense<0.000000e+00> : vector<16xf32>
    %150 = vector.multi_reduction <add>, %149, %cst_51 [1] : vector<16x32xf32> to vector<16xf32>
    %151 = vector.shape_cast %150 : vector<16xf32> to vector<16x1xf32>
    %cst_52 = arith.constant 3.200000e+01 : f32
    %152 = vector.broadcast %cst_52 : f32 to vector<16x1xf32>
    %153 = arith.divf %151, %152 : vector<16x1xf32>
    %154 = vector.broadcast %146 : vector<16x1xf32> to vector<16x32xf32>
    %155 = arith.subf %142, %154 : vector<16x32xf32>
    %cst_53 = arith.constant 9.99999971E-10 : f32
    %156 = vector.broadcast %cst_53 : f32 to vector<16x1xf32>
    %157 = arith.addf %153, %156 : vector<16x1xf32>
    %158 = math.rsqrt %157 : vector<16x1xf32>
    %159 = vector.broadcast %158 : vector<16x1xf32> to vector<16x32xf32>
    %160 = arith.mulf %155, %159 : vector<16x32xf32>
    %161 = vector.broadcast %50 : vector<1x32xf32> to vector<16x32xf32>
    %162 = arith.mulf %160, %161 : vector<16x32xf32>
    %163 = vector.broadcast %51 : vector<1x32xf32> to vector<16x32xf32>
    %164 = arith.addf %162, %163 : vector<16x32xf32>
    %cst_54 = arith.constant dense<0.000000e+00> : vector<16x64xf32>
    %165 = tpu.matmul %164, %43, %cst_54 {dimension_numbers = #tpu.dot_dimension_numbers<[1], [0], [0], [1], [0, 0, 1, 1], [], []>} : vector<16x32xf32>, vector<32x64xf32>, vector<16x64xf32> -> vector<16x64xf32>
    %166 = vector.broadcast %52 : vector<1x64xf32> to vector<16x64xf32>
    %167 = arith.addf %165, %166 : vector<16x64xf32>
    %cst_55 = arith.constant 5.000000e-01 : f32
    %168 = vector.broadcast %cst_55 : f32 to vector<16x64xf32>
    %169 = arith.mulf %168, %167 : vector<16x64xf32>
    %170 = arith.mulf %167, %167 : vector<16x64xf32>
    %171 = arith.mulf %167, %170 : vector<16x64xf32>
    %cst_56 = arith.constant 4.471500e-02 : f32
    %172 = vector.broadcast %cst_56 : f32 to vector<16x64xf32>
    %173 = arith.mulf %172, %171 : vector<16x64xf32>
    %174 = arith.addf %167, %173 : vector<16x64xf32>
    %cst_57 = arith.constant 0.797884583 : f32
    %175 = vector.broadcast %cst_57 : f32 to vector<16x64xf32>
    %176 = arith.mulf %175, %174 : vector<16x64xf32>
    %177 = math.tanh %176 : vector<16x64xf32>
    %cst_58 = arith.constant 1.000000e+00 : f32
    %178 = vector.broadcast %cst_58 : f32 to vector<16x64xf32>
    %179 = arith.addf %178, %177 : vector<16x64xf32>
    %180 = arith.mulf %169, %179 : vector<16x64xf32>
    %cst_59 = arith.constant dense<0.000000e+00> : vector<16x32xf32>
    %181 = tpu.matmul %180, %45, %cst_59 {dimension_numbers = #tpu.dot_dimension_numbers<[1], [0], [0], [1], [0, 0, 1, 1], [], []>} : vector<16x64xf32>, vector<64x32xf32>, vector<16x32xf32> -> vector<16x32xf32>
    %182 = vector.broadcast %53 : vector<1x32xf32> to vector<16x32xf32>
    %183 = arith.addf %181, %182 : vector<16x32xf32>
    %184 = arith.addf %164, %183 : vector<16x32xf32>
    %cst_60 = arith.constant dense<0.000000e+00> : vector<16xf32>
    %185 = vector.multi_reduction <add>, %184, %cst_60 [1] : vector<16x32xf32> to vector<16xf32>
    %186 = vector.shape_cast %185 : vector<16xf32> to vector<16x1xf32>
    %cst_61 = arith.constant 3.200000e+01 : f32
    %187 = vector.broadcast %cst_61 : f32 to vector<16x1xf32>
    %188 = arith.divf %186, %187 : vector<16x1xf32>
    %189 = vector.broadcast %188 : vector<16x1xf32> to vector<16x32xf32>
    %190 = arith.subf %184, %189 : vector<16x32xf32>
    %191 = arith.mulf %190, %190 : vector<16x32xf32>
    %cst_62 = arith.constant dense<0.000000e+00> : vector<16xf32>
    %192 = vector.multi_reduction <add>, %191, %cst_62 [1] : vector<16x32xf32> to vector<16xf32>
    %193 = vector.shape_cast %192 : vector<16xf32> to vector<16x1xf32>
    %cst_63 = arith.constant 3.200000e+01 : f32
    %194 = vector.broadcast %cst_63 : f32 to vector<16x1xf32>
    %195 = arith.divf %193, %194 : vector<16x1xf32>
    %196 = vector.broadcast %188 : vector<16x1xf32> to vector<16x32xf32>
    %197 = arith.subf %184, %196 : vector<16x32xf32>
    %cst_64 = arith.constant 9.99999971E-10 : f32
    %198 = vector.broadcast %cst_64 : f32 to vector<16x1xf32>
    %199 = arith.addf %195, %198 : vector<16x1xf32>
    %200 = math.rsqrt %199 : vector<16x1xf32>
    %201 = vector.broadcast %200 : vector<16x1xf32> to vector<16x32xf32>
    %202 = arith.mulf %197, %201 : vector<16x32xf32>
    %203 = vector.broadcast %54 : vector<1x32xf32> to vector<16x32xf32>
    %204 = arith.mulf %202, %203 : vector<16x32xf32>
    %205 = vector.broadcast %55 : vector<1x32xf32> to vector<16x32xf32>
    %206 = arith.addf %204, %205 : vector<16x32xf32>
    %c1 = arith.constant 1 : index
    %c0_65 = arith.constant 0 : index
    %c0_66 = arith.constant 0 : index
    %207 = vector.load %arg4[%c1, %c0_65, %c0_66] : memref<2x32x96xf32, #tpu.memory_space<vmem>>, vector<1x32x96xf32>
    %208 = vector.shape_cast %207 : vector<1x32x96xf32> to vector<32x96xf32>
    %c1_67 = arith.constant 1 : index
    %c0_68 = arith.constant 0 : index
    %c0_69 = arith.constant 0 : index
    %209 = vector.load %arg5[%c1_67, %c0_68, %c0_69] : memref<2x32x32xf32, #tpu.memory_space<vmem>>, vector<1x32x32xf32>
    %210 = vector.shape_cast %209 : vector<1x32x32xf32> to vector<32x32xf32>
    %c1_70 = arith.constant 1 : index
    %c0_71 = arith.constant 0 : index
    %c0_72 = arith.constant 0 : index
    %211 = vector.load %arg6[%c1_70, %c0_71, %c0_72] : memref<2x32x64xf32, #tpu.memory_space<vmem>>, vector<1x32x64xf32>
    %212 = vector.shape_cast %211 : vector<1x32x64xf32> to vector<32x64xf32>
    %c1_73 = arith.constant 1 : index
    %c0_74 = arith.constant 0 : index
    %c0_75 = arith.constant 0 : index
    %213 = vector.load %arg7[%c1_73, %c0_74, %c0_75] : memref<2x64x32xf32, #tpu.memory_space<vmem>>, vector<1x64x32xf32>
    %214 = vector.shape_cast %213 : vector<1x64x32xf32> to vector<64x32xf32>
    %c1_76 = arith.constant 1 : index
    %c0_77 = arith.constant 0 : index
    %c0_78 = arith.constant 0 : index
    %215 = vector.load %arg8[%c1_76, %c0_77, %c0_78] : memref<2x8x96xf32, #tpu.memory_space<vmem>>, vector<1x8x96xf32>
    %216 = vector.shape_cast %215 : vector<1x8x96xf32> to vector<8x96xf32>
    %217 = vector.extract_strided_slice %216 {offsets = [0, 0], sizes = [1, 96], strides = [1, 1]} : vector<8x96xf32> to vector<1x96xf32>
    %218 = vector.extract_strided_slice %216 {offsets = [1, 0], sizes = [1, 32], strides = [1, 1]} : vector<8x96xf32> to vector<1x32xf32>
    %219 = vector.extract_strided_slice %216 {offsets = [2, 0], sizes = [1, 32], strides = [1, 1]} : vector<8x96xf32> to vector<1x32xf32>
    %220 = vector.extract_strided_slice %216 {offsets = [3, 0], sizes = [1, 32], strides = [1, 1]} : vector<8x96xf32> to vector<1x32xf32>
    %221 = vector.extract_strided_slice %216 {offsets = [4, 0], sizes = [1, 64], strides = [1, 1]} : vector<8x96xf32> to vector<1x64xf32>
    %222 = vector.extract_strided_slice %216 {offsets = [5, 0], sizes = [1, 32], strides = [1, 1]} : vector<8x96xf32> to vector<1x32xf32>
    %223 = vector.extract_strided_slice %216 {offsets = [6, 0], sizes = [1, 32], strides = [1, 1]} : vector<8x96xf32> to vector<1x32xf32>
    %224 = vector.extract_strided_slice %216 {offsets = [7, 0], sizes = [1, 32], strides = [1, 1]} : vector<8x96xf32> to vector<1x32xf32>
    %cst_79 = arith.constant dense<0.000000e+00> : vector<16x96xf32>
    %225 = tpu.matmul %206, %208, %cst_79 {dimension_numbers = #tpu.dot_dimension_numbers<[1], [0], [0], [1], [0, 0, 1, 1], [], []>} : vector<16x32xf32>, vector<32x96xf32>, vector<16x96xf32> -> vector<16x96xf32>
    %226 = vector.broadcast %217 : vector<1x96xf32> to vector<16x96xf32>
    %227 = arith.addf %225, %226 : vector<16x96xf32>
    %228 = vector.extract_strided_slice %227 {offsets = [0, 0], sizes = [16, 32], strides = [1, 1]} : vector<16x96xf32> to vector<16x32xf32>
    %229 = vector.extract_strided_slice %227 {offsets = [0, 32], sizes = [16, 32], strides = [1, 1]} : vector<16x96xf32> to vector<16x32xf32>
    %230 = vector.extract_strided_slice %227 {offsets = [0, 64], sizes = [16, 32], strides = [1, 1]} : vector<16x96xf32> to vector<16x32xf32>
    %231 = vector.extract_strided_slice %228 {offsets = [0, 0], sizes = [16, 8], strides = [1, 1]} : vector<16x32xf32> to vector<16x8xf32>
    %232 = vector.extract_strided_slice %229 {offsets = [0, 0], sizes = [16, 8], strides = [1, 1]} : vector<16x32xf32> to vector<16x8xf32>
    %233 = vector.extract_strided_slice %230 {offsets = [0, 0], sizes = [16, 8], strides = [1, 1]} : vector<16x32xf32> to vector<16x8xf32>
    %234 = tpu.transpose %232, [1, 0] : vector<16x8xf32> -> vector<8x16xf32>
    %cst_80 = arith.constant dense<0.000000e+00> : vector<16x16xf32>
    %235 = tpu.matmul %231, %234, %cst_80 {dimension_numbers = #tpu.dot_dimension_numbers<[1], [0], [0], [1], [0, 0, 1, 1], [], []>} : vector<16x8xf32>, vector<8x16xf32>, vector<16x16xf32> -> vector<16x16xf32>
    %cst_81 = arith.constant 0.353553385 : f32
    %236 = vector.broadcast %cst_81 : f32 to vector<16x16xf32>
    %237 = arith.mulf %235, %236 : vector<16x16xf32>
    %238 = arith.addf %237, %37 : vector<16x16xf32>
    %cst_82 = arith.constant dense<0xFF800000> : vector<16xf32>
    %239 = vector.multi_reduction <maximumf>, %238, %cst_82 [1] : vector<16x16xf32> to vector<16xf32>
    %240 = vector.shape_cast %239 : vector<16xf32> to vector<16x1xf32>
    %241 = vector.broadcast %240 : vector<16x1xf32> to vector<16x16xf32>
    %242 = arith.subf %238, %241 : vector<16x16xf32>
    %243 = math.exp %242 : vector<16x16xf32>
    %cst_83 = arith.constant dense<0.000000e+00> : vector<16xf32>
    %244 = vector.multi_reduction <add>, %243, %cst_83 [1] : vector<16x16xf32> to vector<16xf32>
    %245 = vector.shape_cast %244 : vector<16xf32> to vector<16x1xf32>
    %246 = tpu.reciprocal %245 {approx = true} : vector<16x1xf32> -> vector<16x1xf32>
    %247 = vector.broadcast %246 : vector<16x1xf32> to vector<16x16xf32>
    %248 = arith.mulf %243, %247 : vector<16x16xf32>
    %cst_84 = arith.constant dense<0.000000e+00> : vector<16x8xf32>
    %249 = tpu.matmul %248, %233, %cst_84 {dimension_numbers = #tpu.dot_dimension_numbers<[1], [0], [0], [1], [0, 0, 1, 1], [], []>} : vector<16x16xf32>, vector<16x8xf32>, vector<16x8xf32> -> vector<16x8xf32>
    %250 = vector.extract_strided_slice %228 {offsets = [0, 8], sizes = [16, 8], strides = [1, 1]} : vector<16x32xf32> to vector<16x8xf32>
    %251 = vector.extract_strided_slice %229 {offsets = [0, 8], sizes = [16, 8], strides = [1, 1]} : vector<16x32xf32> to vector<16x8xf32>
    %252 = vector.extract_strided_slice %230 {offsets = [0, 8], sizes = [16, 8], strides = [1, 1]} : vector<16x32xf32> to vector<16x8xf32>
    %253 = tpu.transpose %251, [1, 0] : vector<16x8xf32> -> vector<8x16xf32>
    %cst_85 = arith.constant dense<0.000000e+00> : vector<16x16xf32>
    %254 = tpu.matmul %250, %253, %cst_85 {dimension_numbers = #tpu.dot_dimension_numbers<[1], [0], [0], [1], [0, 0, 1, 1], [], []>} : vector<16x8xf32>, vector<8x16xf32>, vector<16x16xf32> -> vector<16x16xf32>
    %cst_86 = arith.constant 0.353553385 : f32
    %255 = vector.broadcast %cst_86 : f32 to vector<16x16xf32>
    %256 = arith.mulf %254, %255 : vector<16x16xf32>
    %257 = arith.addf %256, %37 : vector<16x16xf32>
    %cst_87 = arith.constant dense<0xFF800000> : vector<16xf32>
    %258 = vector.multi_reduction <maximumf>, %257, %cst_87 [1] : vector<16x16xf32> to vector<16xf32>
    %259 = vector.shape_cast %258 : vector<16xf32> to vector<16x1xf32>
    %260 = vector.broadcast %259 : vector<16x1xf32> to vector<16x16xf32>
    %261 = arith.subf %257, %260 : vector<16x16xf32>
    %262 = math.exp %261 : vector<16x16xf32>
    %cst_88 = arith.constant dense<0.000000e+00> : vector<16xf32>
    %263 = vector.multi_reduction <add>, %262, %cst_88 [1] : vector<16x16xf32> to vector<16xf32>
    %264 = vector.shape_cast %263 : vector<16xf32> to vector<16x1xf32>
    %265 = tpu.reciprocal %264 {approx = true} : vector<16x1xf32> -> vector<16x1xf32>
    %266 = vector.broadcast %265 : vector<16x1xf32> to vector<16x16xf32>
    %267 = arith.mulf %262, %266 : vector<16x16xf32>
    %cst_89 = arith.constant dense<0.000000e+00> : vector<16x8xf32>
    %268 = tpu.matmul %267, %252, %cst_89 {dimension_numbers = #tpu.dot_dimension_numbers<[1], [0], [0], [1], [0, 0, 1, 1], [], []>} : vector<16x16xf32>, vector<16x8xf32>, vector<16x8xf32> -> vector<16x8xf32>
    %269 = vector.extract_strided_slice %228 {offsets = [0, 16], sizes = [16, 8], strides = [1, 1]} : vector<16x32xf32> to vector<16x8xf32>
    %270 = vector.extract_strided_slice %229 {offsets = [0, 16], sizes = [16, 8], strides = [1, 1]} : vector<16x32xf32> to vector<16x8xf32>
    %271 = vector.extract_strided_slice %230 {offsets = [0, 16], sizes = [16, 8], strides = [1, 1]} : vector<16x32xf32> to vector<16x8xf32>
    %272 = tpu.transpose %270, [1, 0] : vector<16x8xf32> -> vector<8x16xf32>
    %cst_90 = arith.constant dense<0.000000e+00> : vector<16x16xf32>
    %273 = tpu.matmul %269, %272, %cst_90 {dimension_numbers = #tpu.dot_dimension_numbers<[1], [0], [0], [1], [0, 0, 1, 1], [], []>} : vector<16x8xf32>, vector<8x16xf32>, vector<16x16xf32> -> vector<16x16xf32>
    %cst_91 = arith.constant 0.353553385 : f32
    %274 = vector.broadcast %cst_91 : f32 to vector<16x16xf32>
    %275 = arith.mulf %273, %274 : vector<16x16xf32>
    %276 = arith.addf %275, %37 : vector<16x16xf32>
    %cst_92 = arith.constant dense<0xFF800000> : vector<16xf32>
    %277 = vector.multi_reduction <maximumf>, %276, %cst_92 [1] : vector<16x16xf32> to vector<16xf32>
    %278 = vector.shape_cast %277 : vector<16xf32> to vector<16x1xf32>
    %279 = vector.broadcast %278 : vector<16x1xf32> to vector<16x16xf32>
    %280 = arith.subf %276, %279 : vector<16x16xf32>
    %281 = math.exp %280 : vector<16x16xf32>
    %cst_93 = arith.constant dense<0.000000e+00> : vector<16xf32>
    %282 = vector.multi_reduction <add>, %281, %cst_93 [1] : vector<16x16xf32> to vector<16xf32>
    %283 = vector.shape_cast %282 : vector<16xf32> to vector<16x1xf32>
    %284 = tpu.reciprocal %283 {approx = true} : vector<16x1xf32> -> vector<16x1xf32>
    %285 = vector.broadcast %284 : vector<16x1xf32> to vector<16x16xf32>
    %286 = arith.mulf %281, %285 : vector<16x16xf32>
    %cst_94 = arith.constant dense<0.000000e+00> : vector<16x8xf32>
    %287 = tpu.matmul %286, %271, %cst_94 {dimension_numbers = #tpu.dot_dimension_numbers<[1], [0], [0], [1], [0, 0, 1, 1], [], []>} : vector<16x16xf32>, vector<16x8xf32>, vector<16x8xf32> -> vector<16x8xf32>
    %288 = vector.extract_strided_slice %228 {offsets = [0, 24], sizes = [16, 8], strides = [1, 1]} : vector<16x32xf32> to vector<16x8xf32>
    %289 = vector.extract_strided_slice %229 {offsets = [0, 24], sizes = [16, 8], strides = [1, 1]} : vector<16x32xf32> to vector<16x8xf32>
    %290 = vector.extract_strided_slice %230 {offsets = [0, 24], sizes = [16, 8], strides = [1, 1]} : vector<16x32xf32> to vector<16x8xf32>
    %291 = tpu.transpose %289, [1, 0] : vector<16x8xf32> -> vector<8x16xf32>
    %cst_95 = arith.constant dense<0.000000e+00> : vector<16x16xf32>
    %292 = tpu.matmul %288, %291, %cst_95 {dimension_numbers = #tpu.dot_dimension_numbers<[1], [0], [0], [1], [0, 0, 1, 1], [], []>} : vector<16x8xf32>, vector<8x16xf32>, vector<16x16xf32> -> vector<16x16xf32>
    %cst_96 = arith.constant 0.353553385 : f32
    %293 = vector.broadcast %cst_96 : f32 to vector<16x16xf32>
    %294 = arith.mulf %292, %293 : vector<16x16xf32>
    %295 = arith.addf %294, %37 : vector<16x16xf32>
    %cst_97 = arith.constant dense<0xFF800000> : vector<16xf32>
    %296 = vector.multi_reduction <maximumf>, %295, %cst_97 [1] : vector<16x16xf32> to vector<16xf32>
    %297 = vector.shape_cast %296 : vector<16xf32> to vector<16x1xf32>
    %298 = vector.broadcast %297 : vector<16x1xf32> to vector<16x16xf32>
    %299 = arith.subf %295, %298 : vector<16x16xf32>
    %300 = math.exp %299 : vector<16x16xf32>
    %cst_98 = arith.constant dense<0.000000e+00> : vector<16xf32>
    %301 = vector.multi_reduction <add>, %300, %cst_98 [1] : vector<16x16xf32> to vector<16xf32>
    %302 = vector.shape_cast %301 : vector<16xf32> to vector<16x1xf32>
    %303 = tpu.reciprocal %302 {approx = true} : vector<16x1xf32> -> vector<16x1xf32>
    %304 = vector.broadcast %303 : vector<16x1xf32> to vector<16x16xf32>
    %305 = arith.mulf %300, %304 : vector<16x16xf32>
    %cst_99 = arith.constant dense<0.000000e+00> : vector<16x8xf32>
    %306 = tpu.matmul %305, %290, %cst_99 {dimension_numbers = #tpu.dot_dimension_numbers<[1], [0], [0], [1], [0, 0, 1, 1], [], []>} : vector<16x16xf32>, vector<16x8xf32>, vector<16x8xf32> -> vector<16x8xf32>
    %307 = tpu.concatenate %249, %268, %287, %306 in 1 : vector<16x8xf32>, vector<16x8xf32>, vector<16x8xf32>, vector<16x8xf32> -> vector<16x32xf32>
    %cst_100 = arith.constant dense<0.000000e+00> : vector<16x32xf32>
    %308 = tpu.matmul %307, %210, %cst_100 {dimension_numbers = #tpu.dot_dimension_numbers<[1], [0], [0], [1], [0, 0, 1, 1], [], []>} : vector<16x32xf32>, vector<32x32xf32>, vector<16x32xf32> -> vector<16x32xf32>
    %309 = vector.broadcast %218 : vector<1x32xf32> to vector<16x32xf32>
    %310 = arith.addf %308, %309 : vector<16x32xf32>
    %311 = arith.addf %206, %310 : vector<16x32xf32>
    %cst_101 = arith.constant dense<0.000000e+00> : vector<16xf32>
    %312 = vector.multi_reduction <add>, %311, %cst_101 [1] : vector<16x32xf32> to vector<16xf32>
    %313 = vector.shape_cast %312 : vector<16xf32> to vector<16x1xf32>
    %cst_102 = arith.constant 3.200000e+01 : f32
    %314 = vector.broadcast %cst_102 : f32 to vector<16x1xf32>
    %315 = arith.divf %313, %314 : vector<16x1xf32>
    %316 = vector.broadcast %315 : vector<16x1xf32> to vector<16x32xf32>
    %317 = arith.subf %311, %316 : vector<16x32xf32>
    %318 = arith.mulf %317, %317 : vector<16x32xf32>
    %cst_103 = arith.constant dense<0.000000e+00> : vector<16xf32>
    %319 = vector.multi_reduction <add>, %318, %cst_103 [1] : vector<16x32xf32> to vector<16xf32>
    %320 = vector.shape_cast %319 : vector<16xf32> to vector<16x1xf32>
    %cst_104 = arith.constant 3.200000e+01 : f32
    %321 = vector.broadcast %cst_104 : f32 to vector<16x1xf32>
    %322 = arith.divf %320, %321 : vector<16x1xf32>
    %323 = vector.broadcast %315 : vector<16x1xf32> to vector<16x32xf32>
    %324 = arith.subf %311, %323 : vector<16x32xf32>
    %cst_105 = arith.constant 9.99999971E-10 : f32
    %325 = vector.broadcast %cst_105 : f32 to vector<16x1xf32>
    %326 = arith.addf %322, %325 : vector<16x1xf32>
    %327 = math.rsqrt %326 : vector<16x1xf32>
    %328 = vector.broadcast %327 : vector<16x1xf32> to vector<16x32xf32>
    %329 = arith.mulf %324, %328 : vector<16x32xf32>
    %330 = vector.broadcast %219 : vector<1x32xf32> to vector<16x32xf32>
    %331 = arith.mulf %329, %330 : vector<16x32xf32>
    %332 = vector.broadcast %220 : vector<1x32xf32> to vector<16x32xf32>
    %333 = arith.addf %331, %332 : vector<16x32xf32>
    %cst_106 = arith.constant dense<0.000000e+00> : vector<16x64xf32>
    %334 = tpu.matmul %333, %212, %cst_106 {dimension_numbers = #tpu.dot_dimension_numbers<[1], [0], [0], [1], [0, 0, 1, 1], [], []>} : vector<16x32xf32>, vector<32x64xf32>, vector<16x64xf32> -> vector<16x64xf32>
    %335 = vector.broadcast %221 : vector<1x64xf32> to vector<16x64xf32>
    %336 = arith.addf %334, %335 : vector<16x64xf32>
    %cst_107 = arith.constant 5.000000e-01 : f32
    %337 = vector.broadcast %cst_107 : f32 to vector<16x64xf32>
    %338 = arith.mulf %337, %336 : vector<16x64xf32>
    %339 = arith.mulf %336, %336 : vector<16x64xf32>
    %340 = arith.mulf %336, %339 : vector<16x64xf32>
    %cst_108 = arith.constant 4.471500e-02 : f32
    %341 = vector.broadcast %cst_108 : f32 to vector<16x64xf32>
    %342 = arith.mulf %341, %340 : vector<16x64xf32>
    %343 = arith.addf %336, %342 : vector<16x64xf32>
    %cst_109 = arith.constant 0.797884583 : f32
    %344 = vector.broadcast %cst_109 : f32 to vector<16x64xf32>
    %345 = arith.mulf %344, %343 : vector<16x64xf32>
    %346 = math.tanh %345 : vector<16x64xf32>
    %cst_110 = arith.constant 1.000000e+00 : f32
    %347 = vector.broadcast %cst_110 : f32 to vector<16x64xf32>
    %348 = arith.addf %347, %346 : vector<16x64xf32>
    %349 = arith.mulf %338, %348 : vector<16x64xf32>
    %cst_111 = arith.constant dense<0.000000e+00> : vector<16x32xf32>
    %350 = tpu.matmul %349, %214, %cst_111 {dimension_numbers = #tpu.dot_dimension_numbers<[1], [0], [0], [1], [0, 0, 1, 1], [], []>} : vector<16x64xf32>, vector<64x32xf32>, vector<16x32xf32> -> vector<16x32xf32>
    %351 = vector.broadcast %222 : vector<1x32xf32> to vector<16x32xf32>
    %352 = arith.addf %350, %351 : vector<16x32xf32>
    %353 = arith.addf %333, %352 : vector<16x32xf32>
    %cst_112 = arith.constant dense<0.000000e+00> : vector<16xf32>
    %354 = vector.multi_reduction <add>, %353, %cst_112 [1] : vector<16x32xf32> to vector<16xf32>
    %355 = vector.shape_cast %354 : vector<16xf32> to vector<16x1xf32>
    %cst_113 = arith.constant 3.200000e+01 : f32
    %356 = vector.broadcast %cst_113 : f32 to vector<16x1xf32>
    %357 = arith.divf %355, %356 : vector<16x1xf32>
    %358 = vector.broadcast %357 : vector<16x1xf32> to vector<16x32xf32>
    %359 = arith.subf %353, %358 : vector<16x32xf32>
    %360 = arith.mulf %359, %359 : vector<16x32xf32>
    %cst_114 = arith.constant dense<0.000000e+00> : vector<16xf32>
    %361 = vector.multi_reduction <add>, %360, %cst_114 [1] : vector<16x32xf32> to vector<16xf32>
    %362 = vector.shape_cast %361 : vector<16xf32> to vector<16x1xf32>
    %cst_115 = arith.constant 3.200000e+01 : f32
    %363 = vector.broadcast %cst_115 : f32 to vector<16x1xf32>
    %364 = arith.divf %362, %363 : vector<16x1xf32>
    %365 = vector.broadcast %357 : vector<16x1xf32> to vector<16x32xf32>
    %366 = arith.subf %353, %365 : vector<16x32xf32>
    %cst_116 = arith.constant 9.99999971E-10 : f32
    %367 = vector.broadcast %cst_116 : f32 to vector<16x1xf32>
    %368 = arith.addf %364, %367 : vector<16x1xf32>
    %369 = math.rsqrt %368 : vector<16x1xf32>
    %370 = vector.broadcast %369 : vector<16x1xf32> to vector<16x32xf32>
    %371 = arith.mulf %366, %370 : vector<16x32xf32>
    %372 = vector.broadcast %223 : vector<1x32xf32> to vector<16x32xf32>
    %373 = arith.mulf %371, %372 : vector<16x32xf32>
    %374 = vector.broadcast %224 : vector<1x32xf32> to vector<16x32xf32>
    %375 = arith.addf %373, %374 : vector<16x32xf32>
    %c0_117 = arith.constant 0 : index
    %c0_118 = arith.constant 0 : index
    %376 = vector.load %arg9[%c0_117, %c0_118] : memref<16x32xf32, #tpu.memory_space<vmem>>, vector<16x32xf32>
    tpu.vector_store %arg9[%c0_117, %c0_118], %375 {strides = array<i32>} : memref<16x32xf32, #tpu.memory_space<vmem>>, vector<16x32xf32>,
    return
  }
  func.func @transform_0(%arg0: i32) -> (i32, i32) {
    %c0_i32 = arith.constant 0 : i32
    %c0_i32_0 = arith.constant 0 : i32
    %c0_i32_1 = arith.constant 0 : i32
    return %c0_i32, %c0_i32_0 : i32, i32
  }
  func.func @transform_1(%arg0: i32) -> (i32, i32) {
    %c0_i32 = arith.constant 0 : i32
    %c0_i32_0 = arith.constant 0 : i32
    %c0_i32_1 = arith.constant 0 : i32
    return %c0_i32, %c0_i32_0 : i32, i32
  }
  func.func @transform_2(%arg0: i32) -> (i32, i32) {
    %c0_i32 = arith.constant 0 : i32
    %c0_i32_0 = arith.constant 0 : i32
    %c0_i32_1 = arith.constant 0 : i32
    return %c0_i32, %c0_i32_0 : i32, i32
  }
  func.func @transform_3(%arg0: i32) -> (i32, i32, i32) {
    %c0_i32 = arith.constant 0 : i32
    %c0_i32_0 = arith.constant 0 : i32
    %c0_i32_1 = arith.constant 0 : i32
    %c0_i32_2 = arith.constant 0 : i32
    return %c0_i32, %c0_i32_0, %c0_i32_1 : i32, i32, i32
  }
  func.func @transform_4(%arg0: i32) -> (i32, i32, i32) {
    %c0_i32 = arith.constant 0 : i32
    %c0_i32_0 = arith.constant 0 : i32
    %c0_i32_1 = arith.constant 0 : i32
    %c0_i32_2 = arith.constant 0 : i32
    return %c0_i32, %c0_i32_0, %c0_i32_1 : i32, i32, i32
  }
  func.func @transform_5(%arg0: i32) -> (i32, i32, i32) {
    %c0_i32 = arith.constant 0 : i32
    %c0_i32_0 = arith.constant 0 : i32
    %c0_i32_1 = arith.constant 0 : i32
    %c0_i32_2 = arith.constant 0 : i32
    return %c0_i32, %c0_i32_0, %c0_i32_1 : i32, i32, i32
  }
  func.func @transform_6(%arg0: i32) -> (i32, i32, i32) {
    %c0_i32 = arith.constant 0 : i32
    %c0_i32_0 = arith.constant 0 : i32
    %c0_i32_1 = arith.constant 0 : i32
    %c0_i32_2 = arith.constant 0 : i32
    return %c0_i32, %c0_i32_0, %c0_i32_1 : i32, i32, i32
  }
  func.func @transform_7(%arg0: i32) -> (i32, i32, i32) {
    %c0_i32 = arith.constant 0 : i32
    %c0_i32_0 = arith.constant 0 : i32
    %c0_i32_1 = arith.constant 0 : i32
    %c0_i32_2 = arith.constant 0 : i32
    return %c0_i32, %c0_i32_0, %c0_i32_1 : i32, i32, i32
  }
  func.func @transform_8(%arg0: i32) -> (i32, i32) {
    %c0_i32 = arith.constant 0 : i32
    %c0_i32_0 = arith.constant 0 : i32
    %c0_i32_1 = arith.constant 0 : i32
    return %c0_i32, %c0_i32_0 : i32, i32
  }
}

</mosaic_0001>

<bundles_post_ra>
// kernel: forward.1
= control target key start
LH: loop header
LB: loop body
LE: loop exit
PB: predicated region body
PF: predicated region fallthrough
CT: control target
= control target key end

     0   :  { %vm33_vm0 = vcmask 261120   ;;  %s2339_s0 = inlined_call_operand.vmem [shape: f32[16,32], index: 0, kind: input, shape index: {}]   ;;  %s2340_s1 = inlined_call_operand.vmem [shape: f32[16,32], index: 1, kind: input, shape index: {}]   ;;  %s2341_s2 = inlined_call_operand.vmem [shape: f32[2,32], index: 2, kind: input, shape index: {}]   ;;  %s2342_s3 = inlined_call_operand.vmem [shape: f32[2,32,96], index: 3, kind: input, shape index: {}]   ;;  %s2343_s4 = inlined_call_operand.vmem [shape: f32[2,32,32], index: 4, kind: input, shape index: {}]   ;;  %s2344_s5 = inlined_call_operand.vmem [shape: f32[2,32,64], index: 5, kind: input, shape index: {}]   ;;  %s2345_s6 = inlined_call_operand.vmem [shape: f32[2,64,32], index: 6, kind: input, shape index: {}]   ;;  %s2346_s7 = inlined_call_operand.vmem [shape: f32[2,8,96], index: 7, kind: input, shape index: {}]   ;;  %s2347_s8 = inlined_call_operand.hbm [shape: f32[16,32], index: 8, kind: output, shape index: {}]  }
   0x1   :  { %v31_v0 = vld [vmem:[%s2339_s0] sm:$0xff] }
   0x2   :  { %13 = vsyncpa [#allocation3], 0  ;;  %v34_v1 = vsel %vm33_vm0, %v31_v0, 0.0  ;;  %v32_v2 = vld [vmem:[%s2339_s0 + $0x8] sm:$0xff]  ;;  %v1781_v4 = vmov 32.0   ;;  %v110_v21 = vld [vmem:[%s2342_s3 + $0x18] sm:$0xff] }
   0x3   :  { %35 = vadd.xlane.f32.xlu0 %v34_v1  ;;  %v37_v3 = vsel %vm33_vm0, %v32_v2, 0.0  ;;  %1661 = vrcp.f32 %v1781_v4  ;;  %147 = vmatpush.msra.mxu0 %v110_v21  ;;  %v109_v22 = vld [vmem:[%s2342_s3 + $0x10] sm:$0xff]  ;;  %v108_v23 = vld [vmem:[%s2342_s3 + $0x8] sm:$0xff]  ;;  %v107_v24 = vld [vmem:[%s2342_s3] sm:$0xff]  ;;  %s1782_s23 = smov 88   ;;  %s1784_s24 = smov 80  }
   0x4   :  { %v30_v36 = vld [vmem:[%s2341_s2] sm:$0x3]  ;;  %v92_v55 = vld [vmem:[%s2340_s1 + $0x8] sm:$0xff]  ;;  %s1785_s25 = smov 72   ;;  %s1786_s26 = smov 112   ;;  %vm164_vm8 = vcmask 64512  }
   0x5   :  { %148 = vmatpush.msra.mxu0 %v109_v22  ;;  %v85_v40 = vperm.slane %v30_v36, 0  ;;  %v88_v44 = vperm.slane %v30_v36, 1  ;;  %v91_v48 = vld [vmem:[%s2340_s1] sm:$0xff]  ;;  %s1783_s1 = smov 96   ;;  %s1787_s27 = smov 120   ;;  %vm200_vm10 = vcmask 130048  }
   0x6   :  { %v1892_v58 = vld [vmem:[%s2346_s7] sm:$0xff]  ;;  %s1788_s28 = smov 104   ;;  %v1789_v22 = vmov -1e+30   ;;  %s1790_s29 = smov 64   ;;  %vm586_vm12 = vcmask 195584  }
   0x7   :  { %149 = vmatpush.msra.mxu0 %v108_v23  ;;  %v128_v59 = vperm.slane %v1892_v58, 0  ;;  %s1791_s30 = smov 56   ;;  %s1792_s0 = smov 40  }
   0x8   :  { %s1793_s9 = smov 48   ;;  %s1794_s10 = smov 8  }
   0x9   :  { %v1662_v5 = vpop.eup %1661  ;;  %150 = vmatpush.msra.mxu0 %v107_v24  ;;  %s1795_s11 = smov 24   ;;  %s1796_s12 = smov 16  }
   0xa   :  { %v41_v6 = vmul.f32 32.0, %v1662_v5  ;;  %vm45_vm1 = vweird.f32 %v1662_v5 }
   0xb   :  { %38 = vadd.xlane.f32.xlu0 %v37_v3 }
   0xc   :  { %v42_v7 = vsub.f32 1.0, %v41_v6 }
   0xe   :  { %v43_v8 = vmul.f32 %v1662_v5, %v42_v7 }
  0x10   :  { %v44_v9 = vadd.f32 %v1662_v5, %v43_v8 }
  0x12   :  { %v1852_v10 = vsel %vm45_vm1, %v1662_v5, %v44_v9 }
  0x76   :  { %v36_v11 = vpop.xlane.xlu0 %35 }
  0x77   :  { %v47_v12 = vmul.f32 %v1852_v10, %v36_v11 }
  0x79   :  { %v49_v13 = vsub.f32 %v31_v0, %v47_v12 }
  0x7b   :  { %v51_v14 = vmul.f32 %v49_v13, %v49_v13 }
  0x7d   :  { %v53_v15 = vsel %vm33_vm0, %v51_v14, 0.0 }
  0x7e   :  { %54 = vadd.xlane.f32.xlu1 %v53_v15  ;;  %v39_v16 = vpop.xlane.xlu0 %38  ;;  %v95_v15 = vlaneseq }
  0x7f   :  { %v48_v17 = vmul.f32 %v1852_v10, %v39_v16 }
  0x80   :  { %v96_v16 = vshrl.u32 %v95_v15, 7 }
  0x81   :  { %v50_v18 = vsub.f32 %v32_v2, %v48_v17  ;;  %v99_v17 = vand.u32 127, %v95_v15 }
  0x83   :  { %v52_v19 = vmul.f32 %v50_v18, %v50_v18 }
  0x85   :  { %v56_v20 = vsel %vm33_vm0, %v52_v19, 0.0  ;;  %v102_v19 = vand.u32 4294967288, %v99_v17 }
  0x86   :  { %57 = vadd.xlane.f32.xlu1 %v56_v20  ;;  %v97_v20 = vadd.s32 8, %v96_v16 }
  0xf1   :  { %v55_v25 = vpop.xlane.xlu1 %54 }
  0xf2   :  { %v59_v26 = vmul.f32 %v55_v25, %v1852_v10  ;;  %v101_v25 = vand.u32 4294967288, %v97_v20 }
  0xf4   :  { %v61_v27 = vadd.f32 1e-09, %v59_v26  ;;  %vm104_vm11 = vcmp.eq.s32.totalorder %v101_v25, %v102_v19 }
  0xf6   :  { %1663 = vrsqrt.f32 %v61_v27  ;;  %vm69_vm3 = vweird.f32 %v61_v27 }
  0xf9   :  { %v58_v28 = vpop.xlane.xlu1 %57 }
  0xfa   :  { %v60_v29 = vmul.f32 %v58_v28, %v1852_v10 }
  0xfc   :  { %v1664_v30 = vpop.eup %1663  ;;  %v62_v31 = vadd.f32 1e-09, %v60_v29  ;;  %v1949_v29 = vsel %vm104_vm11, 0.0, %v1789_v22 }
  0xfd   :  { %v64_v32 = vmul.f32 %v1664_v30, %v61_v27  ;;  %vm70_vm2 = vweird.f32 %v1664_v30 }
  0xfe   :  { %1665 = vrsqrt.f32 %v62_v31  ;;  %vm71_vm4 = vmor %vm69_vm3, %vm70_vm2  ;;  %vm79_vm6 = vweird.f32 %v62_v31 }
  0xff   :  { %v65_v33 = vmul.f32 %v1664_v30, %v64_v32 }
 0x101   :  { %v66_v34 = vmul.f32 0.5, %v65_v33 }
 0x103   :  { %v67_v35 = vsub.f32 1.5, %v66_v34 }
 0x104   :  { %v1666_v37 = vpop.eup %1665 }
 0x105   :  { %v68_v38 = vmul.f32 %v1664_v30, %v67_v35  ;;  %v74_v39 = vmul.f32 %v1666_v37, %v62_v31  ;;  %vm80_vm5 = vweird.f32 %v1666_v37 }
 0x106   :  { %vm81_vm7 = vmor %vm79_vm6, %vm80_vm5 }
 0x107   :  { %v72_v41 = vsel %vm71_vm4, %v1664_v30, %v68_v38  ;;  %v75_v42 = vmul.f32 %v1666_v37, %v74_v39  ;;  %vm720_vm4 = vcmask 523264  }
 0x108   :  { %v83_v43 = vmul.f32 %v72_v41, %v49_v13 }
 0x109   :  { %v76_v45 = vmul.f32 0.5, %v75_v42 }
 0x10a   :  { %v86_v46 = vmul.f32 %v85_v40, %v83_v43 }
 0x10b   :  { %v77_v47 = vsub.f32 1.5, %v76_v45 }
 0x10c   :  { %v89_v49 = vadd.f32 %v88_v44, %v86_v46 }
 0x10d   :  { %v78_v50 = vmul.f32 %v1666_v37, %v77_v47 }
 0x10e   :  { %v1878_v51 = vadd.f32 %v91_v48, %v89_v49 }
 0x10f   :  { %v82_v52 = vsel %vm81_vm7, %v1666_v37, %v78_v50 }
 0x110   :  { %v84_v53 = vmul.f32 %v82_v52, %v50_v18  ;;  %1518 = vmatmul.msk.f32.vlgmr.msra.gmra.mxu0 %vm33_vm0, %v1878_v51  ;;  %v100_v18 = vand.u32 4294967288, %v96_v16 }
 0x112   :  { %v87_v54 = vmul.f32 %v85_v40, %v84_v53  ;;  %vm103_vm9 = vcmp.eq.s32.totalorder %v100_v18, %v102_v19 }
 0x113   :  { %v1945_v23 = vsel %vm103_vm9, 0.0, %v1789_v22 }
 0x114   :  { %v90_v56 = vadd.f32 %v88_v44, %v87_v54 }
 0x116   :  { %v1885_v57 = vadd.f32 %v92_v55, %v90_v56 }
 0x118   :  { %1519 = vmatmul.msk.f32.gmra.mxu0 %vm33_vm0, %v1885_v57 }
 0x18d   :  { %v152_v60 = vpop.f32.mrf.mxu0 }
 0x18e   :  { %v1895_v61 = vadd.f32 %v152_v60, %v128_v59 }
 0x190   :  { %262 = vrot.lane.b32.xlu1 %v1895_v61, %s1782_s23 }
 0x195   :  { %v155_v62 = vpop.f32.mrf.mxu0 }
 0x196   :  { %v1899_v63 = vadd.f32 %v155_v62, %v128_v59 }
 0x198   :  { %264 = vrot.lane.b32.xlu0 %v1899_v63, %s1782_s23  ;;  %162 = vrot.lane.b32.xlu2 %v1899_v63, %s1783_s1  ;;  %v1973_v60 = vpack.i.bf16 %v1895_v61, %v1899_v63 }
 0x199   :  { %364 = vrot.lane.b32.xlu1 %v1899_v63, %s1784_s24 }
 0x1a0   :  { %462 = vrot.lane.b32.xlu0 %v1895_v61, %s1785_s25  ;;  %160 = vrot.lane.b32.xlu2 %v1895_v61, %s1783_s1 }
 0x1a1   :  { %358 = vrot.lane.b32.xlu1 %v1895_v61, %s1786_s26 }
 0x1a8   :  { %362 = vrot.lane.b32.xlu0 %v1895_v61, %s1784_s24  ;;  %258 = vrot.lane.b32.xlu2 %v1895_v61, %s1787_s27 }
 0x1b0   :  { %360 = vrot.lane.b32.xlu0 %v1899_v63, %s1786_s26  ;;  %260 = vrot.lane.b32.xlu2 %v1899_v63, %s1787_s27 }
 0x1b8   :  { %464 = vrot.lane.b32.xlu2 %v1899_v63, %s1785_s25 }
 0x1c0   :  { %458 = vrot.lane.b32.xlu2 %v1895_v61, %s1788_s28 }
 0x1c8   :  { %460 = vrot.lane.b32.xlu2 %v1899_v63, %s1788_s28 }
 0x1f2   :  { %v163_v0 = vpop.permute.xlu2 %162 }
 0x1f3   :  { %1520 = vmatpush.xpose.msk.msra.mxu1 %vm164_vm8, %v163_v0 }
 0x1fa   :  { %v161_v1 = vpop.permute.xlu2 %160 }
 0x1fb   :  { %1521 = vmatpush.xpose.msk.msra.mxu1 %vm164_vm8, %v161_v1 }
 0x1fe   :  { %1522 = vmatmul.msk.f32.vlgmr.msra.gmra.mxu1 %vm164_vm8, %v1895_v61 }
 0x202   :  { %v263_v2 = vpop.permute.xlu1 %262  ;;  %v259_v3 = vpop.permute.xlu2 %258 }
 0x206   :  { %1523 = vmatmul.msk.f32.gmra.mxu1 %vm164_vm8, %v1899_v63 }
 0x20a   :  { %v265_v4 = vpop.permute.xlu0 %264  ;;  %v261_v5 = vpop.permute.xlu2 %260 }
 0x20b   :  { %v365_v6 = vpop.permute.xlu1 %364  ;;  %1526 = vmatpush.xpose.msk.msra.mxu3 %vm164_vm8, %v265_v4 }
 0x20c   :  { %1532 = vmatpush.xpose.msk.msrb.mxu0 %vm164_vm8, %v365_v6 }
 0x20f   :  { %1527 = vmatpush.xpose.msk.msra.mxu3 %vm164_vm8, %v263_v2 }
 0x212   :  { %v463_v7 = vpop.permute.xlu0 %462  ;;  %1528 = vmatmul.msk.f32.vlgmr.msra.gmra.mxu3 %vm164_vm8, %v259_v3  ;;  %v465_v8 = vpop.permute.xlu2 %464 }
 0x213   :  { %1538 = vmatpush.xpose.msk.msrb.mxu3 %vm164_vm8, %v465_v8  ;;  %v359_v11 = vpop.permute.xlu1 %358 }
 0x217   :  { %1539 = vmatpush.xpose.msk.msrb.mxu3 %vm164_vm8, %v463_v7 }
 0x21a   :  { %v363_v9 = vpop.permute.xlu0 %362  ;;  %1529 = vmatmul.msk.f32.gmra.mxu3 %vm164_vm8, %v261_v5  ;;  %v459_v12 = vpop.permute.xlu2 %458 }
 0x21b   :  { %1533 = vmatpush.xpose.msk.msrb.mxu0 %vm164_vm8, %v363_v9 }
 0x21e   :  { %1534 = vmatmul.msk.f32.vlgmr.msrb.gmra.mxu0 %vm164_vm8, %v359_v11 }
 0x222   :  { %1540 = vmatmul.msk.f32.vlgmr.msrb.gmra.mxu3 %vm164_vm8, %v459_v12  ;;  %v361_v13 = vpop.permute.xlu0 %360  ;;  %v461_v14 = vpop.permute.xlu2 %460 }
 0x226   :  { %1535 = vmatmul.msk.f32.gmra.mxu0 %vm164_vm8, %v361_v13 }
 0x22a   :  { %1541 = vmatmul.msk.f32.gmra.mxu3 %vm164_vm8, %v461_v14 }
 0x27b   :  { %v190_v21 = vpop.f32.mrf.mxu1 }
 0x27c   :  { %v196_v24 = vmul.f32 0.35355338, %v190_v21 }
 0x27e   :  { %v198_v26 = vadd.f32 %v196_v24, %v1945_v23 }
 0x280   :  { %v201_v27 = vsel %vm200_vm10, %v198_v26, -inf }
 0x281   :  { %202 = vmax.xlane.f32.xlu2 %v201_v27 }
 0x283   :  { %v193_v28 = vpop.f32.mrf.mxu1 }
 0x284   :  { %v197_v30 = vmul.f32 0.35355338, %v193_v28 }
 0x286   :  { %v199_v31 = vadd.f32 %v197_v30, %v1949_v29 }
 0x288   :  { %v204_v32 = vsel %vm200_vm10, %v199_v31, -inf }
 0x289   :  { %205 = vmax.xlane.f32.xlu1 %v204_v32 }
 0x295   :  { %v291_v33 = vpop.f32.mrf.mxu3 }
 0x296   :  { %v297_v39 = vmul.f32 0.35355338, %v291_v33 }
 0x298   :  { %v299_v45 = vadd.f32 %v297_v39, %v1945_v23 }
 0x29a   :  { %v301_v50 = vsel %vm200_vm10, %v299_v45, -inf }
 0x29b   :  { %v391_v34 = vpop.f32.mrf.mxu0 }
 0x29c   :  { %v397_v35 = vmul.f32 0.35355338, %v391_v34 }
 0x29d   :  { %v294_v36 = vpop.f32.mrf.mxu3 }
 0x29e   :  { %v298_v37 = vmul.f32 0.35355338, %v294_v36  ;;  %v399_v38 = vadd.f32 %v397_v35, %v1945_v23 }
 0x2a0   :  { %v401_v40 = vsel %vm200_vm10, %v399_v38, -inf  ;;  %v1956_v41 = vadd.f32 %v298_v37, %v1949_v29 }
 0x2a1   :  { %402 = vmax.xlane.f32.xlu0 %v401_v40 }
 0x2a2   :  { %v304_v42 = vsel %vm200_vm10, %v1956_v41, -inf }
 0x2a3   :  { %v394_v43 = vpop.f32.mrf.mxu0  ;;  %305 = vmax.xlane.f32.xlu2 %v304_v42 }
 0x2a4   :  { %v398_v44 = vmul.f32 0.35355338, %v394_v43 }
 0x2a5   :  { %v491_v46 = vpop.f32.mrf.mxu3 }
 0x2a6   :  { %v1962_v47 = vadd.f32 %v398_v44, %v1949_v29  ;;  %v497_v48 = vmul.f32 0.35355338, %v491_v46 }
 0x2a8   :  { %v404_v49 = vsel %vm200_vm10, %v1962_v47, -inf  ;;  %v499_v52 = vadd.f32 %v497_v48, %v1945_v23 }
 0x2a9   :  { %405 = vmax.xlane.f32.xlu1 %v404_v49  ;;  %302 = vmax.xlane.f32.xlu0 %v301_v50 }
 0x2aa   :  { %v501_v55 = vsel %vm200_vm10, %v499_v52, -inf }
 0x2ad   :  { %v494_v53 = vpop.f32.mrf.mxu3 }
 0x2ae   :  { %v498_v54 = vmul.f32 0.35355338, %v494_v53 }
 0x2b0   :  { %v500_v56 = vadd.f32 %v498_v54, %v1949_v29 }
 0x2b1   :  { %502 = vmax.xlane.f32.xlu1 %v501_v55 }
 0x2b2   :  { %v504_v59 = vsel %vm200_vm10, %v500_v56, -inf }
 0x2b3   :  { %505 = vmax.xlane.f32.xlu2 %v504_v59 }
 0x2cb   :  { %1622 = vrot.lane.b32.xlu2 %v1973_v60, %s1790_s29 }
 0x2f4   :  { %v203_v62 = vpop.xlane.xlu2 %202 }
 0x2f5   :  { %v207_v0 = vsub.f32 %v198_v26, %v203_v62 }
 0x2f7   :  { %v209_v1 = vmul.f32 1.442695, %v207_v0 }
 0x2f9   :  { %1667 = vpow2.f32 %v209_v1 }
 0x2fc   :  { %v206_v2 = vpop.xlane.xlu1 %205 }
 0x2fd   :  { %v208_v3 = vsub.f32 %v199_v31, %v206_v2 }
 0x2ff   :  { %v1668_v4 = vpop.eup %1667  ;;  %v211_v5 = vmul.f32 1.442695, %v208_v3 }
 0x300   :  { %v213_v6 = vsel %vm200_vm10, %v1668_v4, 0.0 }
 0x301   :  { %1669 = vpow2.f32 %v211_v5  ;;  %214 = vadd.xlane.f32.xlu0 %v213_v6 }
 0x307   :  { %v1670_v7 = vpop.eup %1669 }
 0x308   :  { %v216_v61 = vsel %vm200_vm10, %v1670_v7, 0.0 }
 0x309   :  { %217 = vadd.xlane.f32.xlu1 %v216_v61 }
 0x314   :  { %v403_v63 = vpop.xlane.xlu0 %402 }
 0x315   :  { %v407_v8 = vsub.f32 %v399_v38, %v403_v63 }
 0x316   :  { %v306_v13 = vpop.xlane.xlu2 %305 }
 0x317   :  { %v409_v9 = vmul.f32 1.442695, %v407_v8  ;;  %v308_v30 = vsub.f32 %v1956_v41, %v306_v13 }
 0x319   :  { %1671 = vpow2.f32 %v409_v9  ;;  %v311_v31 = vmul.f32 1.442695, %v308_v30 }
 0x31c   :  { %v303_v11 = vpop.xlane.xlu0 %302  ;;  %v406_v28 = vpop.xlane.xlu1 %405 }
 0x31d   :  { %v307_v12 = vsub.f32 %v299_v45, %v303_v11  ;;  %v408_v49 = vsub.f32 %v1962_v47, %v406_v28  ;;  %v111_v28 = vld [vmem:[%s2343_s4] sm:$0xff] }
 0x31f   :  { %v1979_v14 = vpop.eup %1671  ;;  %v309_v15 = vmul.f32 1.442695, %v307_v12 }
 0x320   :  { %v413_v16 = vsel %vm200_vm10, %v1979_v14, 0.0 }
 0x321   :  { %414 = vadd.xlane.f32.xlu2 %v413_v16  ;;  %1673 = vpow2.f32 %v309_v15 }
 0x322   :  { %1627 = vrot.lane.b32.xlu1 %v1973_v60, %s1791_s30 }
 0x324   :  { %v503_v32 = vpop.xlane.xlu1 %502 }
 0x325   :  { %v507_v33 = vsub.f32 %v499_v52, %v503_v32  ;;  %v411_v52 = vmul.f32 1.442695, %v408_v49 }
 0x326   :  { %v506_v17 = vpop.xlane.xlu2 %505 }
 0x327   :  { %v1674_v18 = vpop.eup %1673  ;;  %v508_v24 = vsub.f32 %v500_v56, %v506_v17  ;;  %v509_v34 = vmul.f32 1.442695, %v507_v33 }
 0x328   :  { %v313_v19 = vsel %vm200_vm10, %v1674_v18, 0.0 }
 0x329   :  { %314 = vadd.xlane.f32.xlu0 %v313_v19  ;;  %v511_v25 = vmul.f32 1.442695, %v508_v24 }
 0x32b   :  { %1675 = vpow2.f32 %v511_v25  ;;  %v114_v25 = vld [vmem:[%s2343_s4 + $0x18] sm:$0xff] }
 0x32c   :  { %1677 = vpow2.f32 %v311_v31  ;;  %608 = vmatpush.msra.mxu0 %v114_v25 }
 0x32d   :  { %1679 = vpow2.f32 %v509_v34 }
 0x32e   :  { %v1623_v20 = vpop.permute.xlu2 %1622 }
 0x32f   :  { %v1624_v21 = vunpack.i.l.bf16 %v1623_v20  ;;  %v1625_v22 = vunpack.i.h.bf16 %v1623_v20 }
 0x331   :  { %249 = vmatpush.msra.mxu2 %v1624_v21  ;;  %v1988_v26 = vpop.eup %1675 }
 0x332   :  { %v516_v27 = vsel %vm200_vm10, %v1988_v26, 0.0  ;;  %v1678_v35 = vpop.eup %1677 }
 0x333   :  { %250 = vmatpush.msra.mxu2 %v1625_v22  ;;  %v316_v36 = vsel %vm200_vm10, %v1678_v35, 0.0  ;;  %v1680_v37 = vpop.eup %1679 }
 0x334   :  { %v513_v38 = vsel %vm200_vm10, %v1680_v37, 0.0 }
 0x33d   :  { %1632 = vrot.lane.b32.xlu0 %v1973_v60, %s1792_s0 }
 0x34c   :  { %517 = vadd.xlane.f32.xlu1 %v516_v27  ;;  %v112_v27 = vld [vmem:[%s2343_s4 + $0x8] sm:$0xff] }
 0x367   :  { %317 = vadd.xlane.f32.xlu0 %v316_v36 }
 0x36f   :  { %514 = vadd.xlane.f32.xlu0 %v513_v38 }
 0x374   :  { %v215_v39 = vpop.xlane.xlu0 %214 }
 0x375   :  { %1681 = vrcp.f32 %v215_v39 }
 0x37b   :  { %v1682_v40 = vpop.eup %1681 }
 0x37c   :  { %v218_v42 = vpop.xlane.xlu1 %217  ;;  %v221_v43 = vmul.f32 %v1682_v40, %v1668_v4 }
 0x37d   :  { %1683 = vrcp.f32 %v218_v42 }
 0x37e   :  { %1524 = vmatmul.msk.f32.vlgmr.msra.gmra.mxu2 %vm200_vm10, %v221_v43  ;;  %v589_v43 = vperm.slane %v1892_v58, 1 }
 0x383   :  { %v1684_v41 = vpop.eup %1683  ;;  %1637 = vrot.lane.b32.xlu0 %v1973_v60, %s1793_s9 }
 0x384   :  { %v222_v44 = vmul.f32 %v1684_v41, %v1670_v7 }
 0x386   :  { %1525 = vmatmul.msk.f32.gmra.mxu2 %vm200_vm10, %v222_v44 }
 0x394   :  { %v1628_v45 = vpop.permute.xlu1 %1627  ;;  %v415_v6 = vpop.xlane.xlu2 %414 }
 0x395   :  { %v1629_v46 = vunpack.i.l.bf16 %v1628_v45  ;;  %v1630_v48 = vunpack.i.h.bf16 %v1628_v45 }
 0x397   :  { %349 = vmatpush.msrb.mxu2 %v1629_v46 }
 0x399   :  { %350 = vmatpush.msrb.mxu2 %v1630_v48 }
 0x39c   :  { %v315_v50 = vpop.xlane.xlu0 %314 }
 0x39d   :  { %1685 = vrcp.f32 %v315_v50 }
 0x39e   :  { %1687 = vpow2.f32 %v411_v52 }
 0x3a3   :  { %v1686_v53 = vpop.eup %1685 }
 0x3a4   :  { %v321_v54 = vmul.f32 %v1686_v53, %v1674_v18  ;;  %v1688_v55 = vpop.eup %1687 }
 0x3a5   :  { %v416_v56 = vsel %vm200_vm10, %v1688_v55, 0.0 }
 0x3a6   :  { %1530 = vmatmul.msk.f32.vlgmr.msrb.gmra.mxu2 %vm200_vm10, %v321_v54 }
 0x3ad   :  { %417 = vadd.xlane.f32.xlu0 %v416_v56 }
 0x3af   :  { %v1633_v59 = vpop.permute.xlu0 %1632 }
 0x3b0   :  { %v1634_v60 = vunpack.i.l.bf16 %v1633_v59  ;;  %v1635_v62 = vunpack.i.h.bf16 %v1633_v59 }
 0x3b2   :  { %549 = vmatpush.msra.mxu2 %v1634_v60 }
 0x3b4   :  { %550 = vmatpush.msra.mxu2 %v1635_v62 }
 0x3bf   :  { %v518_v3 = vpop.xlane.xlu1 %517 }
 0x3da   :  { %v318_v0 = vpop.xlane.xlu0 %317 }
 0x3db   :  { %1689 = vrcp.f32 %v318_v0 }
 0x3e1   :  { %v1690_v47 = vpop.eup %1689 }
 0x3e2   :  { %v515_v1 = vpop.xlane.xlu0 %514  ;;  %v322_v2 = vmul.f32 %v1690_v47, %v1678_v35 }
 0x3e3   :  { %1691 = vrcp.f32 %v515_v1  ;;  %v117_v1 = vld [vmem:[%s2344_s5 + $0x10] sm:$0xff] }
 0x3e4   :  { %1531 = vmatmul.msk.f32.gmra.mxu2 %vm200_vm10, %v322_v2  ;;  %1693 = vrcp.f32 %v518_v3  ;;  %v116_v2 = vld [vmem:[%s2344_s5 + $0x8] sm:$0xff]  ;;  %v115_v3 = vld [vmem:[%s2344_s5] sm:$0xff] }
 0x3e5   :  { %1695 = vrcp.f32 %v415_v6 }
 0x3e9   :  { %v1692_v4 = vpop.eup %1691 }
 0x3ea   :  { %v521_v5 = vmul.f32 %v1692_v4, %v1680_v37  ;;  %v1694_v7 = vpop.eup %1693 }
 0x3eb   :  { %v522_v61 = vmul.f32 %v1694_v7, %v1988_v26  ;;  %v1696_v8 = vpop.eup %1695  ;;  %v113_v26 = vld [vmem:[%s2343_s4 + $0x10] sm:$0xff] }
 0x3ec   :  { %1542 = vmatmul.msk.f32.vlgmr.msra.gmra.mxu2 %vm200_vm10, %v521_v5  ;;  %v421_v12 = vmul.f32 %v1696_v8, %v1979_v14  ;;  %609 = vmatpush.msra.mxu0 %v113_v26 }
 0x3ee   :  { %610 = vmatpush.msra.mxu0 %v112_v27 }
 0x3f0   :  { %611 = vmatpush.msra.mxu0 %v111_v28 }
 0x3f4   :  { %1543 = vmatmul.msk.f32.gmra.mxu2 %vm200_vm10, %v522_v61 }
 0x3f5   :  { %v1638_v63 = vpop.permute.xlu0 %1637 }
 0x3f6   :  { %v1639_v9 = vunpack.i.l.bf16 %v1638_v63  ;;  %v1640_v11 = vunpack.i.h.bf16 %v1638_v63 }
 0x3f8   :  { %449 = vmatpush.msrb.mxu1 %v1639_v9 }
 0x3fa   :  { %450 = vmatpush.msrb.mxu1 %v1640_v11 }
 0x3fb   :  { %1536 = vmatmul.msk.f32.vlgmr.msrb.gmra.mxu1 %vm200_vm10, %v421_v12  ;;  %v665_v12 = vperm.slane %v1892_v58, 2 }
 0x401   :  { %v252_v13 = vpop.f32.mrf.mxu2 }
 0x409   :  { %v255_v16 = vpop.f32.mrf.mxu2 }
 0x420   :  { %v418_v15 = vpop.xlane.xlu0 %417 }
 0x421   :  { %1697 = vrcp.f32 %v418_v15 }
 0x427   :  { %v1698_v17 = vpop.eup %1697 }
 0x428   :  { %v422_v18 = vmul.f32 %v1698_v17, %v1688_v55 }
 0x429   :  { %v352_v19 = vpop.f32.mrf.mxu2 }
 0x42a   :  { %1537 = vmatmul.msk.f32.gmra.mxu1 %vm200_vm10, %v422_v18  ;;  %560 = vrot.lane.b32.xlu2 %v352_v19, %s1794_s10 }
 0x467   :  { %v355_v20 = vpop.f32.mrf.mxu2 }
 0x46f   :  { %v552_v21 = vpop.f32.mrf.mxu2 }
 0x470   :  { %576 = vrot.lane.b32.xlu2 %v552_v21, %s1795_s11 }
 0x477   :  { %v555_v22 = vpop.f32.mrf.mxu2 }
 0x478   :  { %v452_v14 = vpop.f32.mrf.mxu1  ;;  %562 = vrot.lane.b32.xlu2 %v355_v20, %s1794_s10 }
 0x479   :  { %568 = vrot.lane.b32.xlu1 %v452_v14, %s1796_s12 }
 0x481   :  { %578 = vrot.lane.b32.xlu1 %v555_v22, %s1795_s11 }
 0x484   :  { %v561_v30 = vpop.permute.xlu2 %560 }
 0x485   :  { %v582_v31 = vsel %vm164_vm8, %v252_v13, %v561_v30 }
 0x4a7   :  { %v455_v24 = vpop.f32.mrf.mxu1 }
 0x4a8   :  { %570 = vrot.lane.b32.xlu0 %v455_v24, %s1796_s12 }
 0x4ca   :  { %v577_v33 = vpop.permute.xlu2 %576 }
 0x4d2   :  { %v563_v36 = vpop.permute.xlu2 %562 }
 0x4d3   :  { %v583_v37 = vsel %vm164_vm8, %v255_v16, %v563_v36  ;;  %v668_v16 = vperm.slane %v1892_v58, 3  ;;  %v123_v36 = vld [vmem:[%s2345_s6 + $0x20] sm:$0xff] }
 0x4eb   :  { %v569_v32 = vpop.permute.xlu1 %568 }
 0x4ec   :  { %v584_v34 = vsel %vm200_vm10, %v582_v31, %v569_v32 }
 0x4ed   :  { %v587_v35 = vsel %vm586_vm12, %v584_v34, %v577_v33  ;;  %v126_v33 = vld [vmem:[%s2345_s6 + $0x38] sm:$0xff]  ;;  %v125_v34 = vld [vmem:[%s2345_s6 + $0x30] sm:$0xff] }
 0x4ee   :  { %1544 = vmatmul.msk.f32.vlgmr.msra.gmra.mxu0 %vm33_vm0, %v587_v35  ;;  %735 = vmatpush.msra.mxu3 %v126_v33  ;;  %v124_v35 = vld [vmem:[%s2345_s6 + $0x28] sm:$0xff] }
 0x4f0   :  { %736 = vmatpush.msra.mxu3 %v125_v34 }
 0x4f2   :  { %737 = vmatpush.msra.mxu3 %v124_v35 }
 0x4f3   :  { %v579_v39 = vpop.permute.xlu1 %578 }
 0x4f4   :  { %738 = vmatpush.msra.mxu3 %v123_v36  ;;  %v796_v36 = vperm.slane %v1892_v58, 6 }
 0x51a   :  { %v571_v38 = vpop.permute.xlu0 %570 }
 0x51b   :  { %v585_v40 = vsel %vm200_vm10, %v583_v37, %v571_v38  ;;  %v122_v37 = vld [vmem:[%s2345_s6 + $0x18] sm:$0xff]  ;;  %v121_v38 = vld [vmem:[%s2345_s6 + $0x10] sm:$0xff] }
 0x51c   :  { %v588_v42 = vsel %vm586_vm12, %v585_v40, %v579_v39  ;;  %739 = vmatpush.msra.mxu3 %v122_v37  ;;  %v120_v39 = vld [vmem:[%s2345_s6 + $0x8] sm:$0xff]  ;;  %v119_v40 = vld [vmem:[%s2345_s6] sm:$0xff] }
 0x51d   :  { %1545 = vmatmul.msk.f32.gmra.mxu0 %vm33_vm0, %v588_v42  ;;  %v671_v42 = vperm.slane %v1892_v58, 4 }
 0x51e   :  { %740 = vmatpush.msra.mxu3 %v121_v38 }
 0x520   :  { %741 = vmatpush.msra.mxu3 %v120_v39  ;;  %v799_v39 = vperm.slane %v1892_v58, 7 }
 0x522   :  { %742 = vmatpush.msra.mxu3 %v119_v40 }
 0x56b   :  { %v613_v41 = vpop.f32.mrf.mxu0 }
 0x56c   :  { %v614_v44 = vadd.f32 %v613_v41, %v589_v43 }
 0x56e   :  { %v619_v45 = vadd.f32 %v614_v44, %v1878_v51 }
 0x570   :  { %v621_v46 = vsel %vm33_vm0, %v619_v45, 0.0 }
 0x571   :  { %622 = vadd.xlane.f32.xlu2 %v621_v46 }
 0x59a   :  { %v616_v48 = vpop.f32.mrf.mxu0 }
 0x59b   :  { %v617_v49 = vadd.f32 %v616_v48, %v589_v43 }
 0x59d   :  { %v620_v50 = vadd.f32 %v617_v49, %v1885_v57  ;;  %v118_v57 = vld [vmem:[%s2344_s5 + $0x18] sm:$0xff] }
 0x59e   :  { %690 = vmatpush.msra.mxu1 %v118_v57 }
 0x59f   :  { %v624_v52 = vsel %vm33_vm0, %v620_v50, 0.0 }
 0x5a0   :  { %625 = vadd.xlane.f32.xlu1 %v624_v52  ;;  %691 = vmatpush.msra.mxu1 %v117_v1 }
 0x5a2   :  { %692 = vmatpush.msra.mxu1 %v116_v2 }
 0x5a4   :  { %693 = vmatpush.msra.mxu1 %v115_v3  ;;  %v719_v3 = vperm.slane %v1892_v58, 5 }
 0x5e4   :  { %v623_v53 = vpop.xlane.xlu2 %622 }
 0x5e5   :  { %v627_v54 = vmul.f32 %v623_v53, %v1852_v10 }
 0x5e7   :  { %v629_v55 = vsub.f32 %v619_v45, %v627_v54 }
 0x5e9   :  { %v631_v56 = vmul.f32 %v629_v55, %v629_v55 }
 0x5eb   :  { %v633_v59 = vsel %vm33_vm0, %v631_v56, 0.0 }
 0x5ec   :  { %634 = vadd.xlane.f32.xlu0 %v633_v59 }
 0x613   :  { %v626_v60 = vpop.xlane.xlu1 %625 }
 0x614   :  { %v628_v51 = vmul.f32 %v626_v60, %v1852_v10 }
 0x616   :  { %v630_v62 = vsub.f32 %v620_v50, %v628_v51 }
 0x618   :  { %v632_v0 = vmul.f32 %v630_v62, %v630_v62 }
 0x61a   :  { %v636_v47 = vsel %vm33_vm0, %v632_v0, 0.0 }
 0x61b   :  { %637 = vadd.xlane.f32.xlu2 %v636_v47 }
 0x65f   :  { %v635_v4 = vpop.xlane.xlu0 %634 }
 0x660   :  { %v639_v5 = vmul.f32 %v635_v4, %v1852_v10 }
 0x662   :  { %v641_v6 = vadd.f32 1e-09, %v639_v5 }
 0x664   :  { %1699 = vrsqrt.f32 %v641_v6  ;;  %vm649_vm14 = vweird.f32 %v641_v6 }
 0x66a   :  { %v1700_v7 = vpop.eup %1699 }
 0x66b   :  { %v644_v61 = vmul.f32 %v1700_v7, %v641_v6  ;;  %vm650_vm13 = vweird.f32 %v1700_v7 }
 0x66c   :  { %vm651_vm15 = vmor %vm649_vm14, %vm650_vm13 }
 0x66d   :  { %v645_v63 = vmul.f32 %v1700_v7, %v644_v61 }
 0x66f   :  { %v646_v8 = vmul.f32 0.5, %v645_v63 }
 0x671   :  { %v647_v9 = vsub.f32 1.5, %v646_v8 }
 0x673   :  { %v648_v11 = vmul.f32 %v1700_v7, %v647_v9 }
 0x675   :  { %v652_v13 = vsel %vm651_vm15, %v1700_v7, %v648_v11 }
 0x676   :  { %v663_v15 = vmul.f32 %v652_v13, %v629_v55 }
 0x678   :  { %v666_v17 = vmul.f32 %v665_v12, %v663_v15 }
 0x67a   :  { %v2059_v18 = vadd.f32 %v668_v16, %v666_v17 }
 0x67c   :  { %1546 = vmatmul.msk.f32.vlgmr.msra.gmra.mxu1 %vm33_vm0, %v2059_v18 }
 0x68e   :  { %v638_v19 = vpop.xlane.xlu2 %637 }
 0x68f   :  { %v640_v20 = vmul.f32 %v638_v19, %v1852_v10 }
 0x691   :  { %v642_v21 = vadd.f32 1e-09, %v640_v20 }
 0x693   :  { %1701 = vrsqrt.f32 %v642_v21  ;;  %vm659_vm2 = vweird.f32 %v642_v21 }
 0x699   :  { %v1702_v14 = vpop.eup %1701 }
 0x69a   :  { %v654_v22 = vmul.f32 %v1702_v14, %v642_v21  ;;  %vm660_vm1 = vweird.f32 %v1702_v14 }
 0x69b   :  { %vm661_vm3 = vmor %vm659_vm2, %vm660_vm1 }
 0x69c   :  { %v655_v24 = vmul.f32 %v1702_v14, %v654_v22  ;;  %v1552_v22 = vld [vmem:[%s2342_s3 + $0x30] sm:$0xff] }
 0x69e   :  { %v656_v25 = vmul.f32 0.5, %v655_v24  ;;  %v1551_v24 = vld [vmem:[%s2342_s3 + $0x28] sm:$0xff] }
 0x6a0   :  { %v657_v26 = vsub.f32 1.5, %v656_v25  ;;  %v1550_v25 = vld [vmem:[%s2342_s3 + $0x20] sm:$0xff] }
 0x6a2   :  { %v658_v27 = vmul.f32 %v1702_v14, %v657_v26 }
 0x6a4   :  { %v662_v28 = vsel %vm661_vm3, %v1702_v14, %v658_v27  ;;  %v1553_v14 = vld [vmem:[%s2342_s3 + $0x38] sm:$0xff] }
 0x6a5   :  { %v664_v30 = vmul.f32 %v662_v28, %v630_v62  ;;  %847 = vmatpush.msrb.mxu2 %v1553_v14 }
 0x6a7   :  { %v667_v31 = vmul.f32 %v665_v12, %v664_v30  ;;  %848 = vmatpush.msrb.mxu2 %v1552_v22 }
 0x6a9   :  { %v670_v32 = vadd.f32 %v668_v16, %v667_v31  ;;  %849 = vmatpush.msrb.mxu2 %v1551_v24 }
 0x6ab   :  { %1547 = vmatmul.msk.f32.gmra.mxu1 %vm33_vm0, %v670_v32  ;;  %850 = vmatpush.msrb.mxu2 %v1550_v25 }
 0x6f9   :  { %v695_v43 = vpop.f32.mrf.mxu1 }
 0x6fa   :  { %v696_v41 = vadd.f32 %v695_v43, %v671_v42 }
 0x6fc   :  { %v703_v44 = vmul.f32 %v696_v41, %v696_v41  ;;  %v701_v52 = vmul.f32 0.5, %v696_v41 }
 0x6fe   :  { %v705_v45 = vmul.f32 %v703_v44, %v696_v41 }
 0x700   :  { %v707_v46 = vmul.f32 0.044715, %v705_v45 }
 0x702   :  { %v709_v48 = vadd.f32 %v707_v46, %v696_v41 }
 0x704   :  { %v711_v49 = vmul.f32 0.7978846, %v709_v48 }
 0x706   :  { %1703 = vtanh.f32 %v711_v49 }
 0x70c   :  { %v1704_v50 = vpop.eup %1703 }
 0x70d   :  { %v715_v53 = vadd.f32 1.0, %v1704_v50 }
 0x70f   :  { %v717_v54 = vmul.f32 %v715_v53, %v701_v52 }
 0x711   :  { %1548 = vmatmul.msk.f32.vlgmr.msra.gmra.mxu3 %vm720_vm4, %v717_v54 }
 0x728   :  { %v698_v55 = vpop.f32.mrf.mxu1 }
 0x729   :  { %v699_v56 = vadd.f32 %v698_v55, %v671_v42 }
 0x72b   :  { %v704_v59 = vmul.f32 %v699_v56, %v699_v56  ;;  %v702_v57 = vmul.f32 0.5, %v699_v56 }
 0x72d   :  { %v706_v60 = vmul.f32 %v704_v59, %v699_v56 }
 0x72f   :  { %v708_v51 = vmul.f32 0.044715, %v706_v60 }
 0x731   :  { %v710_v62 = vadd.f32 %v708_v51, %v699_v56  ;;  %v2127_v56 = vld [vmem:[%s2346_s7 + $0x8] sm:$0xff] }
 0x732   :  { %v828_v59 = vperm.slane %v2127_v56, 0 }
 0x733   :  { %v712_v0 = vmul.f32 0.7978846, %v710_v62 }
 0x735   :  { %1705 = vtanh.f32 %v712_v0 }
 0x73b   :  { %v1706_v47 = vpop.eup %1705 }
 0x73c   :  { %v716_v1 = vadd.f32 1.0, %v1706_v47 }
 0x73e   :  { %v718_v2 = vmul.f32 %v716_v1, %v702_v57 }
 0x740   :  { %1549 = vmatmul.msk.f32.gmra.mxu3 %vm720_vm4, %v718_v2 }
 0x794   :  { %v744_v4 = vpop.f32.mrf.mxu3 }
 0x795   :  { %v745_v5 = vadd.f32 %v744_v4, %v719_v3 }
 0x797   :  { %v750_v6 = vadd.f32 %v745_v5, %v2059_v18 }
 0x799   :  { %v752_v7 = vsel %vm33_vm0, %v750_v6, 0.0 }
 0x79a   :  { %753 = vadd.xlane.f32.xlu1 %v752_v7 }
 0x7c3   :  { %v747_v61 = vpop.f32.mrf.mxu3 }
 0x7c4   :  { %v748_v63 = vadd.f32 %v747_v61, %v719_v3 }
 0x7c6   :  { %v751_v8 = vadd.f32 %v748_v63, %v670_v32 }
 0x7c8   :  { %v755_v9 = vsel %vm33_vm0, %v751_v8, 0.0 }
 0x7c9   :  { %756 = vadd.xlane.f32.xlu2 %v755_v9 }
 0x80d   :  { %v754_v11 = vpop.xlane.xlu1 %753 }
 0x80e   :  { %v758_v12 = vmul.f32 %v754_v11, %v1852_v10 }
 0x810   :  { %v760_v13 = vsub.f32 %v750_v6, %v758_v12 }
 0x812   :  { %v762_v15 = vmul.f32 %v760_v13, %v760_v13 }
 0x814   :  { %v764_v16 = vsel %vm33_vm0, %v762_v15, 0.0 }
 0x815   :  { %765 = vadd.xlane.f32.xlu1 %v764_v16 }
 0x83c   :  { %v757_v17 = vpop.xlane.xlu2 %756 }
 0x83d   :  { %v759_v18 = vmul.f32 %v757_v17, %v1852_v10 }
 0x83f   :  { %v761_v19 = vsub.f32 %v751_v8, %v759_v18 }
 0x841   :  { %v763_v20 = vmul.f32 %v761_v19, %v761_v19 }
 0x843   :  { %v767_v21 = vsel %vm33_vm0, %v763_v20, 0.0 }
 0x844   :  { %768 = vadd.xlane.f32.xlu0 %v767_v21 }
 0x888   :  { %v766_v26 = vpop.xlane.xlu1 %765 }
 0x889   :  { %v770_v27 = vmul.f32 %v766_v26, %v1852_v10 }
 0x88b   :  { %v772_v28 = vadd.f32 1e-09, %v770_v27 }
 0x88d   :  { %1707 = vrsqrt.f32 %v772_v28  ;;  %vm780_vm6 = vweird.f32 %v772_v28 }
 0x893   :  { %v1708_v30 = vpop.eup %1707 }
 0x894   :  { %v775_v31 = vmul.f32 %v1708_v30, %v772_v28  ;;  %vm781_vm5 = vweird.f32 %v1708_v30 }
 0x895   :  { %vm782_vm7 = vmor %vm780_vm6, %vm781_vm5 }
 0x896   :  { %v776_v32 = vmul.f32 %v1708_v30, %v775_v31 }
 0x898   :  { %v777_v33 = vmul.f32 0.5, %v776_v32 }
 0x89a   :  { %v778_v34 = vsub.f32 1.5, %v777_v33 }
 0x89c   :  { %v779_v35 = vmul.f32 %v1708_v30, %v778_v34 }
 0x89e   :  { %v783_v37 = vsel %vm782_vm7, %v1708_v30, %v779_v35 }
 0x89f   :  { %v794_v38 = vmul.f32 %v783_v37, %v760_v13 }
 0x8a1   :  { %v797_v40 = vmul.f32 %v796_v36, %v794_v38 }
 0x8a3   :  { %v2115_v42 = vadd.f32 %v799_v39, %v797_v40 }
 0x8a5   :  { %1571 = vmatmul.msk.f32.vlgmr.msrb.gmra.mxu2 %vm33_vm0, %v2115_v42 }
 0x8b7   :  { %v769_v43 = vpop.xlane.xlu0 %768 }
 0x8b8   :  { %v771_v41 = vmul.f32 %v769_v43, %v1852_v10 }
 0x8ba   :  { %v773_v44 = vadd.f32 1e-09, %v771_v41 }
 0x8bc   :  { %1709 = vrsqrt.f32 %v773_v44  ;;  %vm790_vm11 = vweird.f32 %v773_v44 }
 0x8c2   :  { %v1710_v45 = vpop.eup %1709 }
 0x8c3   :  { %v785_v46 = vmul.f32 %v1710_v45, %v773_v44  ;;  %vm791_vm9 = vweird.f32 %v1710_v45 }
 0x8c4   :  { %vm792_vm13 = vmor %vm790_vm11, %vm791_vm9 }
 0x8c5   :  { %v786_v48 = vmul.f32 %v1710_v45, %v785_v46 }
 0x8c7   :  { %v787_v49 = vmul.f32 0.5, %v786_v48 }
 0x8c9   :  { %v788_v50 = vsub.f32 1.5, %v787_v49 }
 0x8cb   :  { %v789_v52 = vmul.f32 %v1710_v45, %v788_v50 }
 0x8cd   :  { %v793_v58 = vsel %vm792_vm13, %v1710_v45, %v789_v52 }
 0x8ce   :  { %v795_v53 = vmul.f32 %v793_v58, %v761_v19 }
 0x8d0   :  { %v798_v54 = vmul.f32 %v796_v36, %v795_v53 }
 0x8d2   :  { %v2120_v55 = vadd.f32 %v799_v39, %v798_v54 }
 0x8d4   :  { %1572 = vmatmul.msk.f32.gmra.mxu2 %vm33_vm0, %v2120_v55 }
 0x928   :  { %v852_v60 = vpop.f32.mrf.mxu2 }
 0x929   :  { %v2130_v51 = vadd.f32 %v852_v60, %v828_v59 }
 0x92b   :  { %956 = vrot.lane.b32.xlu0 %v2130_v51, %s1787_s27  ;;  %960 = vrot.lane.b32.xlu1 %v2130_v51, %s1782_s23 }
 0x933   :  { %860 = vrot.lane.b32.xlu0 %v2130_v51, %s1783_s1 }
 0x93b   :  { %1160 = vrot.lane.b32.xlu0 %v2130_v51, %s1785_s25 }
 0x943   :  { %1060 = vrot.lane.b32.xlu0 %v2130_v51, %s1784_s24 }
 0x957   :  { %v855_v62 = vpop.f32.mrf.mxu2 }
 0x958   :  { %v2142_v0 = vadd.f32 %v855_v62, %v828_v59 }
 0x95a   :  { %962 = vrot.lane.b32.xlu2 %v2142_v0, %s1782_s23  ;;  %1058 = vrot.lane.b32.xlu0 %v2142_v0, %s1786_s26  ;;  %v1641_v46 = vpack.i.bf16 %v2130_v51, %v2142_v0 }
 0x95b   :  { %958 = vrot.lane.b32.xlu1 %v2142_v0, %s1787_s27  ;;  %s1797_s27 = smov [#allocation2]  }
 0x962   :  { %862 = vrot.lane.b32.xlu2 %v2142_v0, %s1783_s1 }
 0x963   :  { %1156 = vrot.lane.b32.xlu1 %v2130_v51, %s1788_s28 }
 0x96a   :  { %1162 = vrot.lane.b32.xlu2 %v2142_v0, %s1785_s25 }
 0x96b   :  { %1158 = vrot.lane.b32.xlu1 %v2142_v0, %s1788_s28  ;;  %s1504_s28 = sshll.u32 %s1797_s27, 4  ;;  %s1505_s28 = int_to_ptr.vmem [resolvable:$true] %s1504_s28 }
 0x972   :  { %1062 = vrot.lane.b32.xlu2 %v2142_v0, %s1784_s24 }
 0x97a   :  { %1056 = vrot.lane.b32.xlu2 %v2130_v51, %s1786_s26  ;;  %s1506_s26 = sshll.u32 %s2347_s8, 4  ;;  %s1507_s26 = int_to_ptr.hbm [resolvable:$true] %s1506_s26 }
 0x99d   :  { %v957_v47 = vpop.permute.xlu0 %956  ;;  %v961_v1 = vpop.permute.xlu1 %960 }
 0x9a5   :  { %v861_v2 = vpop.permute.xlu0 %860 }
 0x9ad   :  { %v1161_v5 = vpop.permute.xlu0 %1160 }
 0x9b4   :  { %v963_v57 = vpop.permute.xlu2 %962 }
 0x9b5   :  { %1579 = vmatpush.xpose.msk.msrb.mxu3 %vm164_vm8, %v963_v57  ;;  %v1061_v61 = vpop.permute.xlu0 %1060 }
 0x9b9   :  { %1580 = vmatpush.xpose.msk.msrb.mxu3 %vm164_vm8, %v961_v1 }
 0x9bc   :  { %v863_v3 = vpop.permute.xlu2 %862  ;;  %1581 = vmatmul.msk.f32.vlgmr.msrb.gmra.mxu3 %vm164_vm8, %v957_v47 }
 0x9bd   :  { %1573 = vmatpush.xpose.msk.msrb.mxu0 %vm164_vm8, %v863_v3 }
 0x9c1   :  { %1574 = vmatpush.xpose.msk.msrb.mxu0 %vm164_vm8, %v861_v2 }
 0x9c4   :  { %v1163_v4 = vpop.permute.xlu2 %1162  ;;  %1575 = vmatmul.msk.f32.vlgmr.msrb.gmra.mxu0 %vm164_vm8, %v2130_v51 }
 0x9c5   :  { %1591 = vmatpush.xpose.msk.msra.mxu3 %vm164_vm8, %v1163_v4 }
 0x9c9   :  { %1592 = vmatpush.xpose.msk.msra.mxu3 %vm164_vm8, %v1161_v5 }
 0x9cc   :  { %v1063_v6 = vpop.permute.xlu2 %1062  ;;  %1576 = vmatmul.msk.f32.gmra.mxu0 %vm164_vm8, %v2142_v0  ;;  %v1059_v9 = vpop.permute.xlu0 %1058 }
 0x9cd   :  { %v959_v7 = vpop.permute.xlu1 %958  ;;  %1585 = vmatpush.xpose.msk.msra.mxu0 %vm164_vm8, %v1063_v6 }
 0x9ce   :  { %1582 = vmatmul.msk.f32.gmra.mxu3 %vm164_vm8, %v959_v7 }
 0x9d1   :  { %1586 = vmatpush.xpose.msk.msra.mxu0 %vm164_vm8, %v1061_v61 }
 0x9d4   :  { %v1057_v63 = vpop.permute.xlu2 %1056 }
 0x9d5   :  { %v1157_v8 = vpop.permute.xlu1 %1156  ;;  %1587 = vmatmul.msk.f32.vlgmr.msra.gmra.mxu0 %vm164_vm8, %v1057_v63 }
 0x9d6   :  { %1593 = vmatmul.msk.f32.vlgmr.msra.gmra.mxu3 %vm164_vm8, %v1157_v8 }
 0x9dd   :  { %v1159_v11 = vpop.permute.xlu1 %1158  ;;  %1588 = vmatmul.msk.f32.gmra.mxu0 %vm164_vm8, %v1059_v9 }
 0x9de   :  { %1594 = vmatmul.msk.f32.gmra.mxu3 %vm164_vm8, %v1159_v11 }
 0xa3f   :  { %v989_v12 = vpop.f32.mrf.mxu3 }
 0xa40   :  { %v995_v13 = vmul.f32 0.35355338, %v989_v12 }
 0xa41   :  { %v889_v15 = vpop.f32.mrf.mxu0 }
 0xa42   :  { %v895_v16 = vmul.f32 0.35355338, %v889_v15  ;;  %v997_v17 = vadd.f32 %v995_v13, %v1945_v23 }
 0xa44   :  { %v999_v18 = vsel %vm200_vm10, %v997_v17, -inf  ;;  %v897_v19 = vadd.f32 %v895_v16, %v1945_v23 }
 0xa45   :  { %1000 = vmax.xlane.f32.xlu1 %v999_v18 }
 0xa46   :  { %v899_v20 = vsel %vm200_vm10, %v897_v19, -inf }
 0xa47   :  { %900 = vmax.xlane.f32.xlu2 %v899_v20 }
 0xa49   :  { %v892_v21 = vpop.f32.mrf.mxu0 }
 0xa4a   :  { %v896_v14 = vmul.f32 0.35355338, %v892_v21 }
 0xa4c   :  { %v898_v22 = vadd.f32 %v896_v14, %v1949_v29 }
 0xa4e   :  { %v902_v24 = vsel %vm200_vm10, %v898_v22, -inf }
 0xa4f   :  { %903 = vmax.xlane.f32.xlu1 %v902_v24 }
 0xa51   :  { %v992_v25 = vpop.f32.mrf.mxu3 }
 0xa52   :  { %v996_v26 = vmul.f32 0.35355338, %v992_v25  ;;  %v1089_v27 = vpop.f32.mrf.mxu0 }
 0xa53   :  { %v1095_v30 = vmul.f32 0.35355338, %v1089_v27 }
 0xa54   :  { %v998_v28 = vadd.f32 %v996_v26, %v1949_v29 }
 0xa55   :  { %v1097_v34 = vadd.f32 %v1095_v30, %v1945_v23 }
 0xa56   :  { %v1002_v31 = vsel %vm200_vm10, %v998_v28, -inf }
 0xa57   :  { %1003 = vmax.xlane.f32.xlu0 %v1002_v31  ;;  %v1099_v38 = vsel %vm200_vm10, %v1097_v34, -inf }
 0xa59   :  { %v1189_v32 = vpop.f32.mrf.mxu3 }
 0xa5a   :  { %v1195_v33 = vmul.f32 0.35355338, %v1189_v32  ;;  %v1092_v35 = vpop.f32.mrf.mxu0 }
 0xa5b   :  { %v1096_v37 = vmul.f32 0.35355338, %v1092_v35 }
 0xa5c   :  { %v2190_v36 = vadd.f32 %v1195_v33, %v1945_v23 }
 0xa5d   :  { %v2196_v41 = vadd.f32 %v1096_v37, %v1949_v29 }
 0xa5e   :  { %v1199_v39 = vsel %vm200_vm10, %v2190_v36, -inf }
 0xa5f   :  { %1100 = vmax.xlane.f32.xlu0 %v1099_v38  ;;  %1200 = vmax.xlane.f32.xlu2 %v1199_v39  ;;  %v1102_v45 = vsel %vm200_vm10, %v2196_v41, -inf }
 0xa61   :  { %v1192_v40 = vpop.f32.mrf.mxu3 }
 0xa62   :  { %v1196_v43 = vmul.f32 0.35355338, %v1192_v40 }
 0xa64   :  { %v1198_v44 = vadd.f32 %v1196_v43, %v1949_v29 }
 0xa66   :  { %v1202_v23 = vsel %vm200_vm10, %v1198_v44, -inf }
 0xa67   :  { %1103 = vmax.xlane.f32.xlu2 %v1102_v45  ;;  %1203 = vmax.xlane.f32.xlu1 %v1202_v23 }
 0xa7f   :  { %1642 = vrot.lane.b32.xlu2 %v1641_v46, %s1791_s30 }
 0xab8   :  { %v1001_v48 = vpop.xlane.xlu1 %1000 }
 0xab9   :  { %v1005_v49 = vsub.f32 %v997_v17, %v1001_v48 }
 0xaba   :  { %v901_v50 = vpop.xlane.xlu2 %900 }
 0xabb   :  { %v1007_v52 = vmul.f32 1.442695, %v1005_v49  ;;  %v905_v58 = vsub.f32 %v897_v19, %v901_v50 }
 0xabd   :  { %1711 = vpow2.f32 %v1007_v52  ;;  %v907_v53 = vmul.f32 1.442695, %v905_v58 }
 0xabf   :  { %1713 = vpow2.f32 %v907_v53 }
 0xac2   :  { %v904_v29 = vpop.xlane.xlu1 %903 }
 0xac3   :  { %v1712_v54 = vpop.eup %1711  ;;  %v906_v59 = vsub.f32 %v898_v22, %v904_v29 }
 0xac4   :  { %v1011_v60 = vsel %vm200_vm10, %v1712_v54, 0.0 }
 0xac5   :  { %v2206_v62 = vpop.eup %1713  ;;  %v909_v47 = vmul.f32 1.442695, %v906_v59  ;;  %1012 = vadd.xlane.f32.xlu0 %v1011_v60 }
 0xac6   :  { %v911_v51 = vsel %vm200_vm10, %v2206_v62, 0.0 }
 0xac7   :  { %1715 = vpow2.f32 %v909_v47  ;;  %912 = vadd.xlane.f32.xlu1 %v911_v51 }
 0xaca   :  { %v1004_v0 = vpop.xlane.xlu0 %1003 }
 0xacb   :  { %v1006_v57 = vsub.f32 %v998_v28, %v1004_v0 }
 0xacd   :  { %v2210_v1 = vpop.eup %1715  ;;  %v1009_v2 = vmul.f32 1.442695, %v1006_v57 }
 0xace   :  { %v914_v3 = vsel %vm200_vm10, %v2210_v1, 0.0 }
 0xacf   :  { %1717 = vpow2.f32 %v1009_v2  ;;  %915 = vadd.xlane.f32.xlu0 %v914_v3 }
 0xad2   :  { %v1101_v4 = vpop.xlane.xlu0 %1100  ;;  %v1201_v5 = vpop.xlane.xlu2 %1200 }
 0xad3   :  { %v1105_v6 = vsub.f32 %v1097_v34, %v1101_v4  ;;  %v1205_v19 = vsub.f32 %v2190_v36, %v1201_v5 }
 0xad5   :  { %v1718_v7 = vpop.eup %1717  ;;  %v1107_v61 = vmul.f32 1.442695, %v1105_v6  ;;  %v1207_v21 = vmul.f32 1.442695, %v1205_v19 }
 0xad6   :  { %v1014_v63 = vsel %vm200_vm10, %v1718_v7, 0.0 }
 0xad7   :  { %1719 = vpow2.f32 %v1107_v61  ;;  %1015 = vadd.xlane.f32.xlu0 %v1014_v63 }
 0xada   :  { %v1104_v8 = vpop.xlane.xlu2 %1103  ;;  %v1204_v16 = vpop.xlane.xlu1 %1203 }
 0xadb   :  { %v1206_v17 = vsub.f32 %v1198_v44, %v1204_v16  ;;  %v1106_v28 = vsub.f32 %v2196_v41, %v1104_v8  ;;  %v1557_v8 = vld [vmem:[%s2343_s4 + $0x38] sm:$0xff] }
 0xadc   :  { %1305 = vmatpush.msrb.mxu0 %v1557_v8 }
 0xadd   :  { %v2215_v9 = vpop.eup %1719  ;;  %v1209_v18 = vmul.f32 1.442695, %v1206_v17  ;;  %v1109_v31 = vmul.f32 1.442695, %v1106_v28 }
 0xade   :  { %v1111_v11 = vsel %vm200_vm10, %v2215_v9, 0.0 }
 0xadf   :  { %1112 = vadd.xlane.f32.xlu2 %v1111_v11  ;;  %1721 = vpow2.f32 %v1209_v18  ;;  %v1555_v11 = vld [vmem:[%s2343_s4 + $0x28] sm:$0xff] }
 0xae0   :  { %1647 = vrot.lane.b32.xlu1 %v1641_v46, %s1790_s29  ;;  %1723 = vpow2.f32 %v1207_v21 }
 0xae2   :  { %v1643_v12 = vpop.permute.xlu2 %1642 }
 0xae3   :  { %v1644_v13 = vunpack.i.l.bf16 %v1643_v12  ;;  %v1645_v15 = vunpack.i.h.bf16 %v1643_v12  ;;  %v1554_v12 = vld [vmem:[%s2343_s4 + $0x20] sm:$0xff] }
 0xae5   :  { %1047 = vmatpush.msra.mxu2 %v1644_v13  ;;  %v1722_v20 = vpop.eup %1721 }
 0xae6   :  { %v1214_v14 = vsel %vm200_vm10, %v1722_v20, 0.0  ;;  %v1724_v22 = vpop.eup %1723 }
 0xae7   :  { %1048 = vmatpush.msra.mxu2 %v1645_v15  ;;  %v1211_v24 = vsel %vm200_vm10, %v1724_v22, 0.0 }
 0xaeb   :  { %1652 = vrot.lane.b32.xlu0 %v1641_v46, %s1792_s0 }
 0xb0a   :  { %1215 = vadd.xlane.f32.xlu1 %v1214_v14 }
 0xb15   :  { %1212 = vadd.xlane.f32.xlu0 %v1211_v24 }
 0xb29   :  { %1657 = vrot.lane.b32.xlu0 %v1641_v46, %s1793_s9 }
 0xb38   :  { %v1013_v25 = vpop.xlane.xlu0 %1012 }
 0xb39   :  { %1725 = vrcp.f32 %v1013_v25 }
 0xb3a   :  { %1727 = vpow2.f32 %v1109_v31  ;;  %v913_v32 = vpop.xlane.xlu1 %912 }
 0xb3f   :  { %v1726_v26 = vpop.eup %1725 }
 0xb40   :  { %v1019_v27 = vmul.f32 %v1726_v26, %v1712_v54  ;;  %v1728_v34 = vpop.eup %1727  ;;  %v1286_v26 = vperm.slane %v2127_v56, 1 }
 0xb41   :  { %v1114_v37 = vsel %vm200_vm10, %v1728_v34, 0.0 }
 0xb42   :  { %1583 = vmatmul.msk.f32.vlgmr.msra.gmra.mxu2 %vm200_vm10, %v1019_v27  ;;  %v916_v30 = vpop.xlane.xlu0 %915 }
 0xb4a   :  { %v1016_v33 = vpop.xlane.xlu0 %1015 }
 0xb4b   :  { %1729 = vrcp.f32 %v1016_v33 }
 0xb4c   :  { %1731 = vrcp.f32 %v913_v32 }
 0xb4d   :  { %1733 = vrcp.f32 %v916_v30 }
 0xb51   :  { %v1730_v35 = vpop.eup %1729 }
 0xb52   :  { %v1648_v36 = vpop.permute.xlu1 %1647  ;;  %v1020_v38 = vmul.f32 %v1730_v35, %v1718_v7  ;;  %v1732_v39 = vpop.eup %1731 }
 0xb53   :  { %v1649_v40 = vunpack.i.l.bf16 %v1648_v36  ;;  %1115 = vadd.xlane.f32.xlu0 %v1114_v37  ;;  %v1650_v43 = vunpack.i.h.bf16 %v1648_v36  ;;  %v919_v41 = vmul.f32 %v1732_v39, %v2206_v62  ;;  %v1734_v44 = vpop.eup %1733  ;;  %v1113_v53 = vpop.xlane.xlu2 %1112 }
 0xb54   :  { %1584 = vmatmul.msk.f32.gmra.mxu2 %vm200_vm10, %v1020_v38  ;;  %v920_v46 = vmul.f32 %v1734_v44, %v2210_v1 }
 0xb55   :  { %947 = vmatpush.msrb.mxu1 %v1649_v40 }
 0xb57   :  { %948 = vmatpush.msrb.mxu1 %v1650_v43 }
 0xb58   :  { %1577 = vmatmul.msk.f32.vlgmr.msrb.gmra.mxu1 %vm200_vm10, %v919_v41 }
 0xb5d   :  { %v1653_v45 = vpop.permute.xlu0 %1652 }
 0xb5e   :  { %v1654_v23 = vunpack.i.l.bf16 %v1653_v45  ;;  %v1655_v48 = vunpack.i.h.bf16 %v1653_v45 }
 0xb60   :  { %1578 = vmatmul.msk.f32.gmra.mxu1 %vm200_vm10, %v920_v46  ;;  %1247 = vmatpush.msrb.mxu2 %v1654_v23  ;;  %v1560_v23 = vld [vmem:[%s2344_s5 + $0x30] sm:$0xff]  ;;  %v1559_v46 = vld [vmem:[%s2344_s5 + $0x28] sm:$0xff] }
 0xb62   :  { %1248 = vmatpush.msrb.mxu2 %v1655_v48  ;;  %v1558_v48 = vld [vmem:[%s2344_s5 + $0x20] sm:$0xff] }
 0xb7d   :  { %v1216_v50 = vpop.xlane.xlu1 %1215 }
 0xb88   :  { %v1213_v49 = vpop.xlane.xlu0 %1212 }
 0xb89   :  { %1735 = vrcp.f32 %v1213_v49 }
 0xb8a   :  { %1737 = vrcp.f32 %v1216_v50 }
 0xb8b   :  { %1739 = vrcp.f32 %v1113_v53 }
 0xb8f   :  { %v1736_v52 = vpop.eup %1735 }
 0xb90   :  { %v1219_v58 = vmul.f32 %v1736_v52, %v1724_v22  ;;  %v1738_v29 = vpop.eup %1737 }
 0xb91   :  { %v1220_v54 = vmul.f32 %v1738_v29, %v1722_v20  ;;  %v1740_v60 = vpop.eup %1739 }
 0xb92   :  { %1595 = vmatmul.msk.f32.vlgmr.msrb.gmra.mxu2 %vm200_vm10, %v1219_v58  ;;  %v1119_v51 = vmul.f32 %v1740_v60, %v2215_v9  ;;  %v1556_v9 = vld [vmem:[%s2343_s4 + $0x30] sm:$0xff]  ;;  %s1798_s4 = smov 128  }
 0xb93   :  { %1306 = vmatpush.msrb.mxu0 %v1556_v9 }
 0xb95   :  { %1307 = vmatpush.msrb.mxu0 %v1555_v11 }
 0xb97   :  { %1308 = vmatpush.msrb.mxu0 %v1554_v12 }
 0xb9a   :  { %1596 = vmatmul.msk.f32.gmra.mxu2 %vm200_vm10, %v1220_v54 }
 0xb9b   :  { %v1658_v59 = vpop.permute.xlu0 %1657 }
 0xb9c   :  { %v1659_v62 = vunpack.i.l.bf16 %v1658_v59  ;;  %v1660_v47 = vunpack.i.h.bf16 %v1658_v59 }
 0xb9e   :  { %1147 = vmatpush.msra.mxu1 %v1659_v62  ;;  %v1362_v62 = vperm.slane %v2127_v56, 2 }
 0xba0   :  { %1148 = vmatpush.msra.mxu1 %v1660_v47 }
 0xba1   :  { %1589 = vmatmul.msk.f32.vlgmr.msra.gmra.mxu1 %vm200_vm10, %v1119_v51 }
 0xbc5   :  { %v1050_v0 = vpop.f32.mrf.mxu2 }
 0xbc6   :  { %1258 = vrot.lane.b32.xlu2 %v1050_v0, %s1794_s10  ;;  %v1116_v57 = vpop.xlane.xlu0 %1115  ;;  %v1365_v0 = vperm.slane %v2127_v56, 3 }
 0xbc7   :  { %1741 = vrcp.f32 %v1116_v57 }
 0xbcd   :  { %v1742_v1 = vpop.eup %1741 }
 0xbce   :  { %v1120_v2 = vmul.f32 %v1742_v1, %v1728_v34 }
 0xbd0   :  { %1590 = vmatmul.msk.f32.gmra.mxu1 %vm200_vm10, %v1120_v2 }
 0xbd5   :  { %v950_v3 = vpop.f32.mrf.mxu1 }
 0xbd7   :  { %v1053_v4 = vpop.f32.mrf.mxu2 }
 0xbdd   :  { %v953_v6 = vpop.f32.mrf.mxu1 }
 0xc15   :  { %v1250_v5 = vpop.f32.mrf.mxu2 }
 0xc16   :  { %1274 = vrot.lane.b32.xlu2 %v1250_v5, %s1795_s11 }
 0xc1d   :  { %v1253_v61 = vpop.f32.mrf.mxu2 }
 0xc1e   :  { %1260 = vrot.lane.b32.xlu2 %v1053_v4, %s1794_s10  ;;  %v1150_v7 = vpop.f32.mrf.mxu1 }
 0xc1f   :  { %1266 = vrot.lane.b32.xlu1 %v1150_v7, %s1796_s12 }
 0xc20   :  { %v1259_v13 = vpop.permute.xlu2 %1258 }
 0xc21   :  { %v1280_v15 = vsel %vm164_vm8, %v950_v3, %v1259_v13 }
 0xc27   :  { %1276 = vrot.lane.b32.xlu1 %v1253_v61, %s1795_s11 }
 0xc4d   :  { %v1153_v63 = vpop.f32.mrf.mxu1 }
 0xc4e   :  { %1268 = vrot.lane.b32.xlu0 %v1153_v63, %s1796_s12 }
 0xc70   :  { %v1275_v17 = vpop.permute.xlu2 %1274 }
 0xc78   :  { %v1261_v20 = vpop.permute.xlu2 %1260 }
 0xc79   :  { %v1281_v21 = vsel %vm164_vm8, %v953_v6, %v1261_v20  ;;  %v1564_v20 = vld [vmem:[%s2345_s6 + $0x50] sm:$0xff] }
 0xc91   :  { %v1267_v16 = vpop.permute.xlu1 %1266 }
 0xc92   :  { %v1282_v18 = vsel %vm200_vm10, %v1280_v15, %v1267_v16  ;;  %v1569_v15 = vld [vmem:[%s2345_s6 + $0x78] sm:$0xff]  ;;  %v1568_v16 = vld [vmem:[%s2345_s6 + $0x70] sm:$0xff] }
 0xc93   :  { %v1284_v19 = vsel %vm586_vm12, %v1282_v18, %v1275_v17  ;;  %1431 = vmatpush.msrb.mxu3 %v1569_v15  ;;  %v1567_v17 = vld [vmem:[%s2345_s6 + $0x68] sm:$0xff]  ;;  %v1566_v18 = vld [vmem:[%s2345_s6 + $0x60] sm:$0xff]  ;;  %v1495_v15 = vperm.slane %v2127_v56, 7 }
 0xc94   :  { %1597 = vmatmul.msk.f32.vlgmr.msrb.gmra.mxu0 %vm33_vm0, %v1284_v19  ;;  %v1565_v19 = vld [vmem:[%s2345_s6 + $0x58] sm:$0xff] }
 0xc95   :  { %1432 = vmatpush.msrb.mxu3 %v1568_v16 }
 0xc97   :  { %1433 = vmatpush.msrb.mxu3 %v1567_v17 }
 0xc99   :  { %v1277_v22 = vpop.permute.xlu1 %1276  ;;  %1434 = vmatpush.msrb.mxu3 %v1566_v18 }
 0xc9b   :  { %1435 = vmatpush.msrb.mxu3 %v1565_v19 }
 0xc9d   :  { %1436 = vmatpush.msrb.mxu3 %v1564_v20 }
 0xcc0   :  { %v1269_v14 = vpop.permute.xlu0 %1268 }
 0xcc1   :  { %v1283_v24 = vsel %vm200_vm10, %v1281_v21, %v1269_v14  ;;  %v1563_v21 = vld [vmem:[%s2345_s6 + $0x48] sm:$0xff]  ;;  %v1562_v14 = vld [vmem:[%s2345_s6 + $0x40] sm:$0xff] }
 0xcc2   :  { %v1285_v25 = vsel %vm586_vm12, %v1283_v24, %v1277_v22  ;;  %1437 = vmatpush.msrb.mxu3 %v1563_v21  ;;  %v1368_v22 = vperm.slane %v2127_v56, 4 }
 0xcc3   :  { %1598 = vmatmul.msk.f32.gmra.mxu0 %vm33_vm0, %v1285_v25 }
 0xcc4   :  { %1438 = vmatpush.msrb.mxu3 %v1562_v14 }
 0xd11   :  { %v1310_v27 = vpop.f32.mrf.mxu0 }
 0xd12   :  { %v1311_v28 = vadd.f32 %v1310_v27, %v1286_v26 }
 0xd14   :  { %v1316_v30 = vadd.f32 %v1311_v28, %v2115_v42 }
 0xd16   :  { %v1318_v31 = vsel %vm33_vm0, %v1316_v30, 0.0 }
 0xd17   :  { %1319 = vadd.xlane.f32.xlu2 %v1318_v31 }
 0xd40   :  { %v1313_v32 = vpop.f32.mrf.mxu0 }
 0xd41   :  { %v1314_v33 = vadd.f32 %v1313_v32, %v1286_v26 }
 0xd43   :  { %v1317_v34 = vadd.f32 %v1314_v33, %v2120_v55  ;;  %v1561_v55 = vld [vmem:[%s2344_s5 + $0x38] sm:$0xff] }
 0xd44   :  { %1387 = vmatpush.msrb.mxu1 %v1561_v55 }
 0xd45   :  { %v1321_v35 = vsel %vm33_vm0, %v1317_v34, 0.0 }
 0xd46   :  { %1322 = vadd.xlane.f32.xlu1 %v1321_v35  ;;  %1388 = vmatpush.msrb.mxu1 %v1560_v23  ;;  %v1416_v23 = vperm.slane %v2127_v56, 5 }
 0xd48   :  { %1389 = vmatpush.msrb.mxu1 %v1559_v46 }
 0xd4a   :  { %1390 = vmatpush.msrb.mxu1 %v1558_v48 }
 0xd8a   :  { %v1320_v36 = vpop.xlane.xlu2 %1319 }
 0xd8b   :  { %v1324_v37 = vmul.f32 %v1320_v36, %v1852_v10 }
 0xd8d   :  { %v1326_v38 = vsub.f32 %v1316_v30, %v1324_v37 }
 0xd8f   :  { %v1328_v39 = vmul.f32 %v1326_v38, %v1326_v38 }
 0xd91   :  { %v1330_v40 = vsel %vm33_vm0, %v1328_v39, 0.0 }
 0xd92   :  { %1331 = vadd.xlane.f32.xlu0 %v1330_v40 }
 0xdb9   :  { %v1323_v43 = vpop.xlane.xlu1 %1322 }
 0xdba   :  { %v1325_v42 = vmul.f32 %v1323_v43, %v1852_v10 }
 0xdbc   :  { %v1327_v41 = vsub.f32 %v1317_v34, %v1325_v42 }
 0xdbe   :  { %v1329_v44 = vmul.f32 %v1327_v41, %v1327_v41 }
 0xdc0   :  { %v1333_v45 = vsel %vm33_vm0, %v1329_v44, 0.0 }
 0xdc1   :  { %1334 = vadd.xlane.f32.xlu2 %v1333_v45 }
 0xe05   :  { %v1332_v49 = vpop.xlane.xlu0 %1331 }
 0xe06   :  { %v1336_v50 = vmul.f32 %v1332_v49, %v1852_v10 }
 0xe08   :  { %v1338_v52 = vadd.f32 1e-09, %v1336_v50 }
 0xe0a   :  { %1743 = vrsqrt.f32 %v1338_v52  ;;  %vm1346_vm10 = vweird.f32 %v1338_v52 }
 0xe10   :  { %v1744_v58 = vpop.eup %1743 }
 0xe11   :  { %v1341_v53 = vmul.f32 %v1744_v58, %v1338_v52  ;;  %vm1347_vm8 = vweird.f32 %v1744_v58 }
 0xe12   :  { %vm1348_vm12 = vmor %vm1346_vm10, %vm1347_vm8 }
 0xe13   :  { %v1342_v29 = vmul.f32 %v1744_v58, %v1341_v53 }
 0xe15   :  { %v1343_v54 = vmul.f32 0.5, %v1342_v29 }
 0xe17   :  { %v1344_v59 = vsub.f32 1.5, %v1343_v54 }
 0xe19   :  { %v1345_v60 = vmul.f32 %v1744_v58, %v1344_v59 }
 0xe1b   :  { %v1349_v47 = vsel %vm1348_vm12, %v1744_v58, %v1345_v60 }
 0xe1c   :  { %v1360_v51 = vmul.f32 %v1349_v47, %v1326_v38 }
 0xe1e   :  { %v1363_v57 = vmul.f32 %v1362_v62, %v1360_v51 }
 0xe20   :  { %v2288_v1 = vadd.f32 %v1365_v0, %v1363_v57 }
 0xe22   :  { %1599 = vmatmul.msk.f32.vlgmr.msrb.gmra.mxu1 %vm33_vm0, %v2288_v1 }
 0xe34   :  { %v1335_v2 = vpop.xlane.xlu2 %1334 }
 0xe35   :  { %v1337_v3 = vmul.f32 %v1335_v2, %v1852_v10 }
 0xe37   :  { %v1339_v4 = vadd.f32 1e-09, %v1337_v3 }
 0xe39   :  { %1745 = vrsqrt.f32 %v1339_v4  ;;  %vm1356_vm15 = vweird.f32 %v1339_v4 }
 0xe3f   :  { %v1746_v5 = vpop.eup %1745 }
 0xe40   :  { %v1351_v6 = vmul.f32 %v1746_v5, %v1339_v4  ;;  %vm1357_vm14 = vweird.f32 %v1746_v5 }
 0xe41   :  { %vm1358_vm1 = vmor %vm1356_vm15, %vm1357_vm14 }
 0xe42   :  { %v1352_v7 = vmul.f32 %v1746_v5, %v1351_v6 }
 0xe44   :  { %v1353_v61 = vmul.f32 0.5, %v1352_v7 }
 0xe46   :  { %v1354_v63 = vsub.f32 1.5, %v1353_v61 }
 0xe48   :  { %v1355_v8 = vmul.f32 %v1746_v5, %v1354_v63 }
 0xe4a   :  { %v1359_v9 = vsel %vm1358_vm1, %v1746_v5, %v1355_v8 }
 0xe4b   :  { %v1361_v11 = vmul.f32 %v1359_v9, %v1327_v41 }
 0xe4d   :  { %v1364_v12 = vmul.f32 %v1362_v62, %v1361_v11  ;;  %v1492_v11 = vperm.slane %v2127_v56, 6 }
 0xe4f   :  { %v1367_v13 = vadd.f32 %v1365_v0, %v1364_v12 }
 0xe51   :  { %1600 = vmatmul.msk.f32.gmra.mxu1 %vm33_vm0, %v1367_v13 }
 0xe9f   :  { %v1392_v24 = vpop.f32.mrf.mxu1 }
 0xea0   :  { %v1393_v25 = vadd.f32 %v1392_v24, %v1368_v22 }
 0xea2   :  { %v1400_v26 = vmul.f32 %v1393_v25, %v1393_v25  ;;  %v1398_v33 = vmul.f32 0.5, %v1393_v25 }
 0xea4   :  { %v1402_v27 = vmul.f32 %v1400_v26, %v1393_v25 }
 0xea6   :  { %v1404_v28 = vmul.f32 0.044715, %v1402_v27 }
 0xea8   :  { %v1406_v30 = vadd.f32 %v1404_v28, %v1393_v25 }
 0xeaa   :  { %v1408_v31 = vmul.f32 0.7978846, %v1406_v30 }
 0xeac   :  { %1747 = vtanh.f32 %v1408_v31 }
 0xeb2   :  { %v1748_v32 = vpop.eup %1747 }
 0xeb3   :  { %v1412_v34 = vadd.f32 1.0, %v1748_v32 }
 0xeb5   :  { %v1414_v35 = vmul.f32 %v1412_v34, %v1398_v33 }
 0xeb7   :  { %1601 = vmatmul.msk.f32.vlgmr.msrb.gmra.mxu3 %vm720_vm4, %v1414_v35 }
 0xece   :  { %v1395_v36 = vpop.f32.mrf.mxu1 }
 0xecf   :  { %v1396_v37 = vadd.f32 %v1395_v36, %v1368_v22 }
 0xed1   :  { %v1401_v38 = vmul.f32 %v1396_v37, %v1396_v37  ;;  %v1399_v44 = vmul.f32 0.5, %v1396_v37 }
 0xed3   :  { %v1403_v39 = vmul.f32 %v1401_v38, %v1396_v37 }
 0xed5   :  { %v1405_v40 = vmul.f32 0.044715, %v1403_v39 }
 0xed7   :  { %v1407_v43 = vadd.f32 %v1405_v40, %v1396_v37 }
 0xed9   :  { %v1409_v42 = vmul.f32 0.7978846, %v1407_v43 }
 0xedb   :  { %1749 = vtanh.f32 %v1409_v42 }
 0xee1   :  { %v1750_v41 = vpop.eup %1749 }
 0xee2   :  { %v1413_v45 = vadd.f32 1.0, %v1750_v41 }
 0xee4   :  { %v1415_v55 = vmul.f32 %v1413_v45, %v1399_v44 }
 0xee6   :  { %1602 = vmatmul.msk.f32.gmra.mxu3 %vm720_vm4, %v1415_v55 }
 0xf3a   :  { %v1440_v46 = vpop.f32.mrf.mxu3 }
 0xf3b   :  { %v1441_v48 = vadd.f32 %v1440_v46, %v1416_v23 }
 0xf3d   :  { %v1446_v49 = vadd.f32 %v1441_v48, %v2288_v1 }
 0xf3f   :  { %v1448_v50 = vsel %vm33_vm0, %v1446_v49, 0.0 }
 0xf40   :  { %1449 = vadd.xlane.f32.xlu1 %v1448_v50 }
 0xf69   :  { %v1443_v52 = vpop.f32.mrf.mxu3 }
 0xf6a   :  { %v1444_v58 = vadd.f32 %v1443_v52, %v1416_v23 }
 0xf6c   :  { %v1447_v53 = vadd.f32 %v1444_v58, %v1367_v13 }
 0xf6e   :  { %v1451_v29 = vsel %vm33_vm0, %v1447_v53, 0.0 }
 0xf6f   :  { %1452 = vadd.xlane.f32.xlu2 %v1451_v29 }
 0xfb3   :  { %v1450_v54 = vpop.xlane.xlu1 %1449 }
 0xfb4   :  { %v1454_v59 = vmul.f32 %v1450_v54, %v1852_v10 }
 0xfb6   :  { %v1456_v60 = vsub.f32 %v1446_v49, %v1454_v59 }
 0xfb8   :  { %v1458_v62 = vmul.f32 %v1456_v60, %v1456_v60 }
 0xfba   :  { %v1460_v47 = vsel %vm33_vm0, %v1458_v62, 0.0 }
 0xfbb   :  { %1461 = vadd.xlane.f32.xlu1 %v1460_v47 }
 0xfe2   :  { %v1453_v51 = vpop.xlane.xlu2 %1452 }
 0xfe3   :  { %v1455_v0 = vmul.f32 %v1453_v51, %v1852_v10 }
 0xfe5   :  { %v1457_v57 = vsub.f32 %v1447_v53, %v1455_v0 }
 0xfe7   :  { %v1459_v1 = vmul.f32 %v1457_v57, %v1457_v57 }
 0xfe9   :  { %v1463_v2 = vsel %vm33_vm0, %v1459_v1, 0.0 }
 0xfea   :  { %1464 = vadd.xlane.f32.xlu0 %v1463_v2 }
0x102e   :  { %v1462_v3 = vpop.xlane.xlu1 %1461 }
0x102f   :  { %v1466_v4 = vmul.f32 %v1462_v3, %v1852_v10 }
0x1031   :  { %v1468_v5 = vadd.f32 1e-09, %v1466_v4 }
0x1033   :  { %1751 = vrsqrt.f32 %v1468_v5  ;;  %vm1476_vm3 = vweird.f32 %v1468_v5 }
0x1039   :  { %v1752_v6 = vpop.eup %1751 }
0x103a   :  { %v1471_v7 = vmul.f32 %v1752_v6, %v1468_v5  ;;  %vm1477_vm2 = vweird.f32 %v1752_v6 }
0x103b   :  { %vm1478_vm4 = vmor %vm1476_vm3, %vm1477_vm2 }
0x103c   :  { %v1472_v61 = vmul.f32 %v1752_v6, %v1471_v7 }
0x103e   :  { %v1473_v63 = vmul.f32 0.5, %v1472_v61 }
0x1040   :  { %v1474_v8 = vsub.f32 1.5, %v1473_v63 }
0x1042   :  { %v1475_v9 = vmul.f32 %v1752_v6, %v1474_v8 }
0x1044   :  { %v1479_v12 = vsel %vm1478_vm4, %v1752_v6, %v1475_v9 }
0x1045   :  { %v1490_v13 = vmul.f32 %v1479_v12, %v1456_v60 }
0x1047   :  { %v1493_v16 = vmul.f32 %v1492_v11, %v1490_v13 }
0x1049   :  { %v1496_v17 = vadd.f32 %v1495_v15, %v1493_v16 }
0x104b   :  { %1498 = vst.msk [vmem:[#allocation2] sm:$0xff] %vm33_vm0, %v1496_v17 }
0x105d   :  { %v1465_v18 = vpop.xlane.xlu0 %1464 }
0x105e   :  { %v1467_v19 = vmul.f32 %v1465_v18, %v1852_v10 }
0x1060   :  { %v1469_v20 = vadd.f32 1e-09, %v1467_v19 }
0x1062   :  { %1753 = vrsqrt.f32 %v1469_v20  ;;  %vm1486_vm6 = vweird.f32 %v1469_v20 }
0x1068   :  { %v1754_v21 = vpop.eup %1753 }
0x1069   :  { %v1481_v14 = vmul.f32 %v1754_v21, %v1469_v20  ;;  %vm1487_vm5 = vweird.f32 %v1754_v21 }
0x106a   :  { %vm1488_vm7 = vmor %vm1486_vm6, %vm1487_vm5 }
0x106b   :  { %v1482_v22 = vmul.f32 %v1754_v21, %v1481_v14 }
0x106d   :  { %v1483_v24 = vmul.f32 0.5, %v1482_v22 }
0x106f   :  { %v1484_v25 = vsub.f32 1.5, %v1483_v24 }
0x1071   :  { %v1485_v26 = vmul.f32 %v1754_v21, %v1484_v25 }
0x1073   :  { %v1489_v27 = vsel %vm1488_vm7, %v1754_v21, %v1485_v26 }
0x1074   :  { %v1491_v56 = vmul.f32 %v1489_v27, %v1457_v57 }
0x1076   :  { %v1494_v10 = vmul.f32 %v1492_v11, %v1491_v56 }
0x1078   :  { %v1497_v28 = vadd.f32 %v1495_v15, %v1494_v10 }
0x107a   :  { %1499 = vst.msk [vmem:[#allocation2 + $0x8] sm:$0xff] %vm33_vm0, %v1497_v28 }
0x107b   :  { %1512 = dma.vmem_to_hbm [thread:$0]  %s1505_s28, 256, %s1507_s26, [#allocation3], %s1798_s4, %s1798_s4, %s1794_s10  }
0x107c   :  { %1779 = dma.done.wait [#allocation3], 256  }
0x107d   :  { %1780 = vsyncadd [#allocation3], 4294967040 }
0x107e   :  { %1517 = vsyncpa [#allocation3], 1 }

</bundles_post_ra>
